<compile_context>
chip_gen: v6e
topology: v6e:2x2x1
jax: 0.10.0
libtpu: 0.0.40
codegen_flags: <defaults>
</compile_context>

<pallas_src>
import jax
import jax.numpy as jnp
from jax.experimental import pallas as pl
from jax.experimental.pallas import tpu as pltpu


def _lenet_kernel(x_ref, c1w_ref, c1b_ref, r1_ref, l1_ref,
                  c2w_ref, c2b_ref, r2_ref, l2_ref,
                  f1w_ref, f1b_ref, f2w_ref, f2b_ref, f3w_ref, f3b_ref,
                  o_ref):
    f32 = jnp.float32
    nb = x_ref.shape[0]                       # batch (folded into this single step)

    def mm(a, b):
        return jnp.dot(a, b, preferred_element_type=f32)

    # ---- conv1 (1->6, 5x5, valid): 5 MXU matmuls, one per kw tap -------------
    # x_ref[n] is (28, 28) = [w, h]  (H = 28 sits on lanes).  For tap kw the
    # whole layer's contribution is (N*24, 28) @ (28, 144), contracting over the
    # 28 input H columns against a banded weight matrix built in the wrapper.
    xs = [x_ref[n] for n in range(nb)]                                  # (28, 28) each
    acc1 = c1b_ref[...]                                                 # (1, 144) bias
    for kw in range(5):
        rows = jnp.concatenate([xs[n][kw:kw + 24, :] for n in range(nb)], axis=0)
        acc1 = acc1 + mm(rows, c1w_ref[kw * 28:(kw + 1) * 28, :])
    a1 = jnp.maximum(acc1, 0.0)               # (N*24, 144)  rows=(n,c)  cols=(o,r)

    # ---- pool1: exact 2x2/stride-2 max-pool ----------------------------------
    t1 = jnp.maximum(a1[:, :-1], a1[:, 1:])   # pair-max along r (lanes)
    u1 = mm(t1, r1_ref[...])                  # keep r = 2h            (N*24, 72)
    v1 = jnp.maximum(u1[:-1, :], u1[1:, :])   # pair-max along c (sublanes)
    p1 = mm(l1_ref[...], v1)                  # keep c = 2a            (N*12, 72)

    # ---- conv2 (6->16, 5x5, valid): 5 MXU matmuls, K = 6ch x 12h = 72 --------
    acc2 = c2b_ref[...]                                                 # (1, 128) bias
    for kw in range(5):
        rows = jnp.concatenate(
            [p1[n * 12 + kw:n * 12 + kw + 8, :] for n in range(nb)], axis=0)
        acc2 = acc2 + mm(rows, c2w_ref[kw * 72:(kw + 1) * 72, :])
    a2 = jnp.maximum(acc2, 0.0)               # (N*8, 128)  rows=(n,c)  cols=(o2,r)

    # ---- pool2 ----------------------------------------------------------------
    t2 = jnp.maximum(a2[:, :-1], a2[:, 1:])
    u2 = mm(t2, r2_ref[...])                  # (N*8, 64)   cols=(o2, a)
    v2 = jnp.maximum(u2[:-1, :], u2[1:, :])
    p2 = mm(l2_ref[...], v2)                  # (4*N, 64)   rows=(b, n)

    # ---- fc1 -> ReLU -> fc2 -> ReLU -> fc3 (no ReLU) --------------------------
    h1 = f1b_ref[...]                                                   # (1, 120)
    for b in range(4):
        h1 = h1 + mm(p2[b * nb:(b + 1) * nb, :],
                     f1w_ref[b * 64:(b + 1) * 64, :])                   # (N,64)@(64,120)
    h1 = jnp.maximum(h1, 0.0)                                           # (N, 120)
    h2 = jnp.maximum(mm(h1, f2w_ref[...]) + f2b_ref[...], 0.0)          # (N, 84)
    o_ref[...] = mm(h2, f3w_ref[...]) + f3b_ref[...]                    # (N, 128) lane-dense


def _build_constants(params, n_batch):
    """One-shot, wrapper-side weight reordering + hoisted pooling selectors."""
    f32 = jnp.float32

    # conv1 banded weights:  C1W[kw*28 + j, o*24 + r] = w1[o, 0, j - r, kw]
    w1 = params["conv1_w"].astype(f32)[:, 0]                   # (6, 5, 5) [o, kh, kw]
    j = jnp.arange(28)[None, :, None, None]
    r = jnp.arange(24)[None, None, None, :]
    kh = j - r
    kw = jnp.arange(5)[:, None, None, None]
    o = jnp.arange(6)[None, None, :, None]
    c1w = jnp.where((kh >= 0) & (kh <= 4), w1[o, jnp.clip(kh, 0, 4), kw], 0.0)
    c1w = c1w.reshape(140, 144)                                # rows (kw, j), cols (o, r)
    c1b = jnp.repeat(params["conv1_b"].astype(f32), 24)[None, :]          # (1, 144)

    # conv2 banded weights:  C2W[kw*72 + ch*12 + h, o*8 + r] = w2[o, ch, h - r, kw]
    w2 = params["conv2_w"].astype(f32)                         # (16, 6, 5, 5)
    h = jnp.arange(12)[None, None, :, None, None]
    r = jnp.arange(8)[None, None, None, None, :]
    kh = h - r
    kw = jnp.arange(5)[:, None, None, None, None]
    ch = jnp.arange(6)[None, :, None, None, None]
    o = jnp.arange(16)[None, None, None, :, None]
    c2w = jnp.where((kh >= 0) & (kh <= 4), w2[o, ch, jnp.clip(kh, 0, 4), kw], 0.0)
    c2w = c2w.reshape(360, 128)                                # rows (kw, ch, h), cols (o, r)
    c2b = jnp.repeat(params["conv2_b"].astype(f32), 8)[None, :]           # (1, 128)

    # Hoisted 0/1 compaction selectors for the two max-pools.
    i = jnp.arange(143)[:, None]; jj = jnp.arange(72)[None, :]
    r1 = (i == (jj // 12) * 24 + 2 * (jj % 12)).astype(f32)               # (143, 72)
    i = jnp.arange(n_batch * 12)[:, None]; jj = jnp.arange(n_batch * 24 - 1)[None, :]
    l1 = (jj == (i // 12) * 24 + 2 * (i % 12)).astype(f32)                # (N*12, N*24-1)
    i = jnp.arange(127)[:, None]; jj = jnp.arange(64)[None, :]
    r2 = (i == (jj // 4) * 8 + 2 * (jj % 4)).astype(f32)                  # (127, 64)
    i = jnp.arange(4 * n_batch)[:, None]; jj = jnp.arange(n_batch * 8 - 1)[None, :]
    l2 = (jj == (i % n_batch) * 8 + 2 * (i // n_batch)).astype(f32)       # (4N, 8N-1)

    # fc1 columns reordered from PyTorch's (o, h, w) flatten to the kernel's (w, o, h) rows.
    f1w = jnp.transpose(params["fc1_w"].astype(f32).reshape(120, 16, 4, 4),
                        (3, 1, 2, 0)).reshape(256, 120)
    f1b = params["fc1_b"].astype(f32)[None, :]                            # (1, 120)
    f2w = params["fc2_w"].astype(f32).T                                   # (120, 84)
    f2b = params["fc2_b"].astype(f32)[None, :]                            # (1, 84)
    # fc3 padded to 128 output lanes -> one lane-dense output store.
    f3w = jnp.zeros((84, 128), f32).at[:, :10].set(params["fc3_w"].astype(f32).T)
    f3b = jnp.zeros((1, 128), f32).at[0, :10].set(params["fc3_b"].astype(f32))

    return (c1w, c1b, r1, l1, c2w, c2b, r2, l2, f1w, f1b, f2w, f2b, f3w, f3b)


def init_params(key):
    ks = jax.random.split(key, 10)
    s = 0.1
    return {
        "conv1_w": jax.random.normal(ks[0], (6, 1, 5, 5), jnp.float32) * s,
        "conv1_b": jax.random.normal(ks[1], (6,), jnp.float32) * s,
        "conv2_w": jax.random.normal(ks[2], (16, 6, 5, 5), jnp.float32) * s,
        "conv2_b": jax.random.normal(ks[3], (16,), jnp.float32) * s,
        "fc1_w": jax.random.normal(ks[4], (120, 16 * 4 * 4), jnp.float32) * s,
        "fc1_b": jax.random.normal(ks[5], (120,), jnp.float32) * s,
        "fc2_w": jax.random.normal(ks[6], (84, 120), jnp.float32) * s,
        "fc2_b": jax.random.normal(ks[7], (84,), jnp.float32) * s,
        "fc3_w": jax.random.normal(ks[8], (10, 84), jnp.float32) * s,
        "fc3_b": jax.random.normal(ks[9], (10,), jnp.float32) * s,
    }


def lenet_forward(params, x_nchw):
    n = x_nchw.shape[0]
    assert x_nchw.shape[1:] == (1, 28, 28), x_nchw.shape
    f32 = jnp.float32
    # Pass the image as (N, W=28, H=28): the 28-wide H axis sits on lanes.
    x_t = jnp.transpose(x_nchw[:, 0], (0, 2, 1)).astype(f32)
    consts = _build_constants(params, n)
    in_arrays = (x_t,) + consts

    def fullspec(shape):
        if len(shape) == 2:
            return pl.BlockSpec(shape, lambda i: (0, 0))
        return pl.BlockSpec(shape, lambda i: (0, 0, 0))

    out = pl.pallas_call(
        _lenet_kernel,
        out_shape=jax.ShapeDtypeStruct((n, 128), f32),
        grid=(1,),                                  # batch folded into one step
        in_specs=[fullspec(a.shape) for a in in_arrays],
        out_specs=fullspec((n, 128)),
        compiler_params=pltpu.CompilerParams(dimension_semantics=("arbitrary",)),
    )(*in_arrays)
    # TODO(synk): on v7x the two TensorCores could be used by re-splitting the
    # batch across a parallel grid axis; single-step is optimal for v5e/v6e.
    return out[:, :10]


if __name__ == "__main__":
    key = jax.random.PRNGKey(0)
    k_param, k_input = jax.random.split(key)
    params = init_params(k_param)
    # LeNet-5 geometry (fc1 = 16*4*4) forces 28x28 spatial input; batch = 2.
    x = jax.random.normal(k_input, (2, 1, 28, 28), jnp.float32)
    out = jax.jit(lenet_forward)(params, x)
    out = jax.block_until_ready(out)
    assert out.shape == (2, 10), out.shape
    assert out.dtype == jnp.float32
    print("KERNEL_OK")
</pallas_src>

<mosaic_0001>
module attributes {stable_mosaic.version = 11 : i64} {
  func.func @_lenet_kernel(%arg0: i32, %arg1: memref<2x28x28xf32, #tpu.memory_space<vmem>>, %arg2: memref<140x144xf32, #tpu.memory_space<vmem>>, %arg3: memref<1x144xf32, #tpu.memory_space<vmem>>, %arg4: memref<143x72xf32, #tpu.memory_space<vmem>>, %arg5: memref<24x47xf32, #tpu.memory_space<vmem>>, %arg6: memref<360x128xf32, #tpu.memory_space<vmem>>, %arg7: memref<1x128xf32, #tpu.memory_space<vmem>>, %arg8: memref<127x64xf32, #tpu.memory_space<vmem>>, %arg9: memref<8x15xf32, #tpu.memory_space<vmem>>, %arg10: memref<256x120xf32, #tpu.memory_space<vmem>>, %arg11: memref<1x120xf32, #tpu.memory_space<vmem>>, %arg12: memref<120x84xf32, #tpu.memory_space<vmem>>, %arg13: memref<1x84xf32, #tpu.memory_space<vmem>>, %arg14: memref<84x128xf32, #tpu.memory_space<vmem>>, %arg15: memref<1x128xf32, #tpu.memory_space<vmem>>, %arg16: memref<2x128xf32, #tpu.memory_space<vmem>>) attributes {dimension_semantics = [#tpu.dimension_semantics<arbitrary>], iteration_bounds = array<i64: 1>, scalar_prefetch = 0 : i64, scratch_operands = 0 : i64, tpu.core_type = #tpu.core_type<tc>, window_params = [{pipeline_mode = #tpu.pipeline_mode<synchronous>, transform_indices = @transform_0, window_bounds = array<i64: 2, 28, 28>}, {pipeline_mode = #tpu.pipeline_mode<synchronous>, transform_indices = @transform_1, window_bounds = array<i64: 140, 144>}, {pipeline_mode = #tpu.pipeline_mode<synchronous>, transform_indices = @transform_2, window_bounds = array<i64: 1, 144>}, {pipeline_mode = #tpu.pipeline_mode<synchronous>, transform_indices = @transform_3, window_bounds = array<i64: 143, 72>}, {pipeline_mode = #tpu.pipeline_mode<synchronous>, transform_indices = @transform_4, window_bounds = array<i64: 24, 47>}, {pipeline_mode = #tpu.pipeline_mode<synchronous>, transform_indices = @transform_5, window_bounds = array<i64: 360, 128>}, {pipeline_mode = #tpu.pipeline_mode<synchronous>, transform_indices = @transform_6, window_bounds = array<i64: 1, 128>}, {pipeline_mode = #tpu.pipeline_mode<synchronous>, transform_indices = @transform_7, window_bounds = array<i64: 127, 64>}, {pipeline_mode = #tpu.pipeline_mode<synchronous>, transform_indices = @transform_8, window_bounds = array<i64: 8, 15>}, {pipeline_mode = #tpu.pipeline_mode<synchronous>, transform_indices = @transform_9, window_bounds = array<i64: 256, 120>}, {pipeline_mode = #tpu.pipeline_mode<synchronous>, transform_indices = @transform_10, window_bounds = array<i64: 1, 120>}, {pipeline_mode = #tpu.pipeline_mode<synchronous>, transform_indices = @transform_11, window_bounds = array<i64: 120, 84>}, {pipeline_mode = #tpu.pipeline_mode<synchronous>, transform_indices = @transform_12, window_bounds = array<i64: 1, 84>}, {pipeline_mode = #tpu.pipeline_mode<synchronous>, transform_indices = @transform_13, window_bounds = array<i64: 84, 128>}, {pipeline_mode = #tpu.pipeline_mode<synchronous>, transform_indices = @transform_14, window_bounds = array<i64: 1, 128>}, {pipeline_mode = #tpu.pipeline_mode<synchronous>, transform_indices = @transform_15, window_bounds = array<i64: 2, 128>}]} {
    %c0 = arith.constant 0 : index
    %c0_0 = arith.constant 0 : index
    %c0_1 = arith.constant 0 : index
    %0 = vector.load %arg1[%c0, %c0_0, %c0_1] : memref<2x28x28xf32, #tpu.memory_space<vmem>>, vector<1x28x28xf32>
    %1 = vector.shape_cast %0 : vector<1x28x28xf32> to vector<28x28xf32>
    %c1 = arith.constant 1 : index
    %c0_2 = arith.constant 0 : index
    %c0_3 = arith.constant 0 : index
    %2 = vector.load %arg1[%c1, %c0_2, %c0_3] : memref<2x28x28xf32, #tpu.memory_space<vmem>>, vector<1x28x28xf32>
    %3 = vector.shape_cast %2 : vector<1x28x28xf32> to vector<28x28xf32>
    %c0_4 = arith.constant 0 : index
    %c0_5 = arith.constant 0 : index
    %4 = vector.load %arg3[%c0_4, %c0_5] : memref<1x144xf32, #tpu.memory_space<vmem>>, vector<1x144xf32>
    %5 = vector.extract_strided_slice %1 {offsets = [0, 0], sizes = [24, 28], strides = [1, 1]} : vector<28x28xf32> to vector<24x28xf32>
    %6 = vector.extract_strided_slice %3 {offsets = [0, 0], sizes = [24, 28], strides = [1, 1]} : vector<28x28xf32> to vector<24x28xf32>
    %7 = tpu.concatenate %5, %6 in 0 : vector<24x28xf32>, vector<24x28xf32> -> vector<48x28xf32>
    %c0_6 = arith.constant 0 : index
    %c0_7 = arith.constant 0 : index
    %8 = vector.load %arg2[%c0_6, %c0_7] : memref<140x144xf32, #tpu.memory_space<vmem>>, vector<28x144xf32>
    %cst = arith.constant dense<0.000000e+00> : vector<48x144xf32>
    %9 = tpu.matmul %7, %8, %cst {dimension_numbers = #tpu.dot_dimension_numbers<[1], [0], [0], [1], [0, 0, 1, 1], [], []>} : vector<48x28xf32>, vector<28x144xf32>, vector<48x144xf32> -> vector<48x144xf32>
    %10 = vector.broadcast %4 : vector<1x144xf32> to vector<48x144xf32>
    %11 = arith.addf %10, %9 : vector<48x144xf32>
    %12 = vector.extract_strided_slice %1 {offsets = [1, 0], sizes = [24, 28], strides = [1, 1]} : vector<28x28xf32> to vector<24x28xf32>
    %13 = vector.extract_strided_slice %3 {offsets = [1, 0], sizes = [24, 28], strides = [1, 1]} : vector<28x28xf32> to vector<24x28xf32>
    %14 = tpu.concatenate %12, %13 in 0 : vector<24x28xf32>, vector<24x28xf32> -> vector<48x28xf32>
    %c28 = arith.constant 28 : index
    %c0_8 = arith.constant 0 : index
    %15 = vector.load %arg2[%c28, %c0_8] : memref<140x144xf32, #tpu.memory_space<vmem>>, vector<28x144xf32>
    %cst_9 = arith.constant dense<0.000000e+00> : vector<48x144xf32>
    %16 = tpu.matmul %14, %15, %cst_9 {dimension_numbers = #tpu.dot_dimension_numbers<[1], [0], [0], [1], [0, 0, 1, 1], [], []>} : vector<48x28xf32>, vector<28x144xf32>, vector<48x144xf32> -> vector<48x144xf32>
    %17 = arith.addf %11, %16 : vector<48x144xf32>
    %18 = vector.extract_strided_slice %1 {offsets = [2, 0], sizes = [24, 28], strides = [1, 1]} : vector<28x28xf32> to vector<24x28xf32>
    %19 = vector.extract_strided_slice %3 {offsets = [2, 0], sizes = [24, 28], strides = [1, 1]} : vector<28x28xf32> to vector<24x28xf32>
    %20 = tpu.concatenate %18, %19 in 0 : vector<24x28xf32>, vector<24x28xf32> -> vector<48x28xf32>
    %c56 = arith.constant 56 : index
    %c0_10 = arith.constant 0 : index
    %21 = vector.load %arg2[%c56, %c0_10] : memref<140x144xf32, #tpu.memory_space<vmem>>, vector<28x144xf32>
    %cst_11 = arith.constant dense<0.000000e+00> : vector<48x144xf32>
    %22 = tpu.matmul %20, %21, %cst_11 {dimension_numbers = #tpu.dot_dimension_numbers<[1], [0], [0], [1], [0, 0, 1, 1], [], []>} : vector<48x28xf32>, vector<28x144xf32>, vector<48x144xf32> -> vector<48x144xf32>
    %23 = arith.addf %17, %22 : vector<48x144xf32>
    %24 = vector.extract_strided_slice %1 {offsets = [3, 0], sizes = [24, 28], strides = [1, 1]} : vector<28x28xf32> to vector<24x28xf32>
    %25 = vector.extract_strided_slice %3 {offsets = [3, 0], sizes = [24, 28], strides = [1, 1]} : vector<28x28xf32> to vector<24x28xf32>
    %26 = tpu.concatenate %24, %25 in 0 : vector<24x28xf32>, vector<24x28xf32> -> vector<48x28xf32>
    %c84 = arith.constant 84 : index
    %c0_12 = arith.constant 0 : index
    %27 = vector.load %arg2[%c84, %c0_12] : memref<140x144xf32, #tpu.memory_space<vmem>>, vector<28x144xf32>
    %cst_13 = arith.constant dense<0.000000e+00> : vector<48x144xf32>
    %28 = tpu.matmul %26, %27, %cst_13 {dimension_numbers = #tpu.dot_dimension_numbers<[1], [0], [0], [1], [0, 0, 1, 1], [], []>} : vector<48x28xf32>, vector<28x144xf32>, vector<48x144xf32> -> vector<48x144xf32>
    %29 = arith.addf %23, %28 : vector<48x144xf32>
    %30 = vector.extract_strided_slice %1 {offsets = [4, 0], sizes = [24, 28], strides = [1, 1]} : vector<28x28xf32> to vector<24x28xf32>
    %31 = vector.extract_strided_slice %3 {offsets = [4, 0], sizes = [24, 28], strides = [1, 1]} : vector<28x28xf32> to vector<24x28xf32>
    %32 = tpu.concatenate %30, %31 in 0 : vector<24x28xf32>, vector<24x28xf32> -> vector<48x28xf32>
    %c112 = arith.constant 112 : index
    %c0_14 = arith.constant 0 : index
    %33 = vector.load %arg2[%c112, %c0_14] : memref<140x144xf32, #tpu.memory_space<vmem>>, vector<28x144xf32>
    %cst_15 = arith.constant dense<0.000000e+00> : vector<48x144xf32>
    %34 = tpu.matmul %32, %33, %cst_15 {dimension_numbers = #tpu.dot_dimension_numbers<[1], [0], [0], [1], [0, 0, 1, 1], [], []>} : vector<48x28xf32>, vector<28x144xf32>, vector<48x144xf32> -> vector<48x144xf32>
    %35 = arith.addf %29, %34 : vector<48x144xf32>
    %cst_16 = arith.constant 0.000000e+00 : f32
    %36 = vector.broadcast %cst_16 : f32 to vector<48x144xf32>
    %37 = arith.maximumf %35, %36 : vector<48x144xf32>
    %38 = vector.extract_strided_slice %37 {offsets = [0, 0], sizes = [48, 143], strides = [1, 1]} : vector<48x144xf32> to vector<48x143xf32>
    %39 = vector.extract_strided_slice %37 {offsets = [0, 1], sizes = [48, 143], strides = [1, 1]} : vector<48x144xf32> to vector<48x143xf32>
    %40 = arith.maximumf %38, %39 : vector<48x143xf32>
    %c0_17 = arith.constant 0 : index
    %c0_18 = arith.constant 0 : index
    %41 = vector.load %arg4[%c0_17, %c0_18] : memref<143x72xf32, #tpu.memory_space<vmem>>, vector<143x72xf32>
    %cst_19 = arith.constant dense<0.000000e+00> : vector<48x72xf32>
    %42 = tpu.matmul %40, %41, %cst_19 {dimension_numbers = #tpu.dot_dimension_numbers<[1], [0], [0], [1], [0, 0, 1, 1], [], []>} : vector<48x143xf32>, vector<143x72xf32>, vector<48x72xf32> -> vector<48x72xf32>
    %43 = vector.extract_strided_slice %42 {offsets = [0, 0], sizes = [47, 72], strides = [1, 1]} : vector<48x72xf32> to vector<47x72xf32>
    %44 = vector.extract_strided_slice %42 {offsets = [1, 0], sizes = [47, 72], strides = [1, 1]} : vector<48x72xf32> to vector<47x72xf32>
    %45 = arith.maximumf %43, %44 : vector<47x72xf32>
    %c0_20 = arith.constant 0 : index
    %c0_21 = arith.constant 0 : index
    %46 = vector.load %arg5[%c0_20, %c0_21] : memref<24x47xf32, #tpu.memory_space<vmem>>, vector<24x47xf32>
    %cst_22 = arith.constant dense<0.000000e+00> : vector<24x72xf32>
    %47 = tpu.matmul %46, %45, %cst_22 {dimension_numbers = #tpu.dot_dimension_numbers<[1], [0], [0], [1], [0, 0, 1, 1], [], []>} : vector<24x47xf32>, vector<47x72xf32>, vector<24x72xf32> -> vector<24x72xf32>
    %c0_23 = arith.constant 0 : index
    %c0_24 = arith.constant 0 : index
    %48 = vector.load %arg7[%c0_23, %c0_24] : memref<1x128xf32, #tpu.memory_space<vmem>>, vector<1x128xf32>
    %49 = vector.extract_strided_slice %47 {offsets = [0, 0], sizes = [8, 72], strides = [1, 1]} : vector<24x72xf32> to vector<8x72xf32>
    %50 = vector.extract_strided_slice %47 {offsets = [12, 0], sizes = [8, 72], strides = [1, 1]} : vector<24x72xf32> to vector<8x72xf32>
    %51 = tpu.concatenate %49, %50 in 0 : vector<8x72xf32>, vector<8x72xf32> -> vector<16x72xf32>
    %c0_25 = arith.constant 0 : index
    %c0_26 = arith.constant 0 : index
    %52 = vector.load %arg6[%c0_25, %c0_26] : memref<360x128xf32, #tpu.memory_space<vmem>>, vector<72x128xf32>
    %cst_27 = arith.constant dense<0.000000e+00> : vector<16x128xf32>
    %53 = tpu.matmul %51, %52, %cst_27 {dimension_numbers = #tpu.dot_dimension_numbers<[1], [0], [0], [1], [0, 0, 1, 1], [], []>} : vector<16x72xf32>, vector<72x128xf32>, vector<16x128xf32> -> vector<16x128xf32>
    %54 = vector.broadcast %48 : vector<1x128xf32> to vector<16x128xf32>
    %55 = arith.addf %54, %53 : vector<16x128xf32>
    %56 = vector.extract_strided_slice %47 {offsets = [1, 0], sizes = [8, 72], strides = [1, 1]} : vector<24x72xf32> to vector<8x72xf32>
    %57 = vector.extract_strided_slice %47 {offsets = [13, 0], sizes = [8, 72], strides = [1, 1]} : vector<24x72xf32> to vector<8x72xf32>
    %58 = tpu.concatenate %56, %57 in 0 : vector<8x72xf32>, vector<8x72xf32> -> vector<16x72xf32>
    %c72 = arith.constant 72 : index
    %c0_28 = arith.constant 0 : index
    %59 = vector.load %arg6[%c72, %c0_28] : memref<360x128xf32, #tpu.memory_space<vmem>>, vector<72x128xf32>
    %cst_29 = arith.constant dense<0.000000e+00> : vector<16x128xf32>
    %60 = tpu.matmul %58, %59, %cst_29 {dimension_numbers = #tpu.dot_dimension_numbers<[1], [0], [0], [1], [0, 0, 1, 1], [], []>} : vector<16x72xf32>, vector<72x128xf32>, vector<16x128xf32> -> vector<16x128xf32>
    %61 = arith.addf %55, %60 : vector<16x128xf32>
    %62 = vector.extract_strided_slice %47 {offsets = [2, 0], sizes = [8, 72], strides = [1, 1]} : vector<24x72xf32> to vector<8x72xf32>
    %63 = vector.extract_strided_slice %47 {offsets = [14, 0], sizes = [8, 72], strides = [1, 1]} : vector<24x72xf32> to vector<8x72xf32>
    %64 = tpu.concatenate %62, %63 in 0 : vector<8x72xf32>, vector<8x72xf32> -> vector<16x72xf32>
    %c144 = arith.constant 144 : index
    %c0_30 = arith.constant 0 : index
    %65 = vector.load %arg6[%c144, %c0_30] : memref<360x128xf32, #tpu.memory_space<vmem>>, vector<72x128xf32>
    %cst_31 = arith.constant dense<0.000000e+00> : vector<16x128xf32>
    %66 = tpu.matmul %64, %65, %cst_31 {dimension_numbers = #tpu.dot_dimension_numbers<[1], [0], [0], [1], [0, 0, 1, 1], [], []>} : vector<16x72xf32>, vector<72x128xf32>, vector<16x128xf32> -> vector<16x128xf32>
    %67 = arith.addf %61, %66 : vector<16x128xf32>
    %68 = vector.extract_strided_slice %47 {offsets = [3, 0], sizes = [8, 72], strides = [1, 1]} : vector<24x72xf32> to vector<8x72xf32>
    %69 = vector.extract_strided_slice %47 {offsets = [15, 0], sizes = [8, 72], strides = [1, 1]} : vector<24x72xf32> to vector<8x72xf32>
    %70 = tpu.concatenate %68, %69 in 0 : vector<8x72xf32>, vector<8x72xf32> -> vector<16x72xf32>
    %c216 = arith.constant 216 : index
    %c0_32 = arith.constant 0 : index
    %71 = vector.load %arg6[%c216, %c0_32] : memref<360x128xf32, #tpu.memory_space<vmem>>, vector<72x128xf32>
    %cst_33 = arith.constant dense<0.000000e+00> : vector<16x128xf32>
    %72 = tpu.matmul %70, %71, %cst_33 {dimension_numbers = #tpu.dot_dimension_numbers<[1], [0], [0], [1], [0, 0, 1, 1], [], []>} : vector<16x72xf32>, vector<72x128xf32>, vector<16x128xf32> -> vector<16x128xf32>
    %73 = arith.addf %67, %72 : vector<16x128xf32>
    %74 = vector.extract_strided_slice %47 {offsets = [4, 0], sizes = [8, 72], strides = [1, 1]} : vector<24x72xf32> to vector<8x72xf32>
    %75 = vector.extract_strided_slice %47 {offsets = [16, 0], sizes = [8, 72], strides = [1, 1]} : vector<24x72xf32> to vector<8x72xf32>
    %76 = tpu.concatenate %74, %75 in 0 : vector<8x72xf32>, vector<8x72xf32> -> vector<16x72xf32>
    %c288 = arith.constant 288 : index
    %c0_34 = arith.constant 0 : index
    %77 = vector.load %arg6[%c288, %c0_34] : memref<360x128xf32, #tpu.memory_space<vmem>>, vector<72x128xf32>
    %cst_35 = arith.constant dense<0.000000e+00> : vector<16x128xf32>
    %78 = tpu.matmul %76, %77, %cst_35 {dimension_numbers = #tpu.dot_dimension_numbers<[1], [0], [0], [1], [0, 0, 1, 1], [], []>} : vector<16x72xf32>, vector<72x128xf32>, vector<16x128xf32> -> vector<16x128xf32>
    %79 = arith.addf %73, %78 : vector<16x128xf32>
    %cst_36 = arith.constant 0.000000e+00 : f32
    %80 = vector.broadcast %cst_36 : f32 to vector<16x128xf32>
    %81 = arith.maximumf %79, %80 : vector<16x128xf32>
    %82 = vector.extract_strided_slice %81 {offsets = [0, 0], sizes = [16, 127], strides = [1, 1]} : vector<16x128xf32> to vector<16x127xf32>
    %83 = vector.extract_strided_slice %81 {offsets = [0, 1], sizes = [16, 127], strides = [1, 1]} : vector<16x128xf32> to vector<16x127xf32>
    %84 = arith.maximumf %82, %83 : vector<16x127xf32>
    %c0_37 = arith.constant 0 : index
    %c0_38 = arith.constant 0 : index
    %85 = vector.load %arg8[%c0_37, %c0_38] : memref<127x64xf32, #tpu.memory_space<vmem>>, vector<127x64xf32>
    %cst_39 = arith.constant dense<0.000000e+00> : vector<16x64xf32>
    %86 = tpu.matmul %84, %85, %cst_39 {dimension_numbers = #tpu.dot_dimension_numbers<[1], [0], [0], [1], [0, 0, 1, 1], [], []>} : vector<16x127xf32>, vector<127x64xf32>, vector<16x64xf32> -> vector<16x64xf32>
    %87 = vector.extract_strided_slice %86 {offsets = [0, 0], sizes = [15, 64], strides = [1, 1]} : vector<16x64xf32> to vector<15x64xf32>
    %88 = vector.extract_strided_slice %86 {offsets = [1, 0], sizes = [15, 64], strides = [1, 1]} : vector<16x64xf32> to vector<15x64xf32>
    %89 = arith.maximumf %87, %88 : vector<15x64xf32>
    %c0_40 = arith.constant 0 : index
    %c0_41 = arith.constant 0 : index
    %90 = vector.load %arg9[%c0_40, %c0_41] : memref<8x15xf32, #tpu.memory_space<vmem>>, vector<8x15xf32>
    %cst_42 = arith.constant dense<0.000000e+00> : vector<8x64xf32>
    %91 = tpu.matmul %90, %89, %cst_42 {dimension_numbers = #tpu.dot_dimension_numbers<[1], [0], [0], [1], [0, 0, 1, 1], [], []>} : vector<8x15xf32>, vector<15x64xf32>, vector<8x64xf32> -> vector<8x64xf32>
    %c0_43 = arith.constant 0 : index
    %c0_44 = arith.constant 0 : index
    %92 = vector.load %arg11[%c0_43, %c0_44] : memref<1x120xf32, #tpu.memory_space<vmem>>, vector<1x120xf32>
    %93 = vector.extract_strided_slice %91 {offsets = [0, 0], sizes = [2, 64], strides = [1, 1]} : vector<8x64xf32> to vector<2x64xf32>
    %c0_45 = arith.constant 0 : index
    %c0_46 = arith.constant 0 : index
    %94 = vector.load %arg10[%c0_45, %c0_46] : memref<256x120xf32, #tpu.memory_space<vmem>>, vector<64x120xf32>
    %cst_47 = arith.constant dense<0.000000e+00> : vector<2x120xf32>
    %95 = tpu.matmul %93, %94, %cst_47 {dimension_numbers = #tpu.dot_dimension_numbers<[1], [0], [0], [1], [0, 0, 1, 1], [], []>} : vector<2x64xf32>, vector<64x120xf32>, vector<2x120xf32> -> vector<2x120xf32>
    %96 = vector.broadcast %92 : vector<1x120xf32> to vector<2x120xf32>
    %97 = arith.addf %96, %95 : vector<2x120xf32>
    %98 = vector.extract_strided_slice %91 {offsets = [2, 0], sizes = [2, 64], strides = [1, 1]} : vector<8x64xf32> to vector<2x64xf32>
    %c64 = arith.constant 64 : index
    %c0_48 = arith.constant 0 : index
    %99 = vector.load %arg10[%c64, %c0_48] : memref<256x120xf32, #tpu.memory_space<vmem>>, vector<64x120xf32>
    %cst_49 = arith.constant dense<0.000000e+00> : vector<2x120xf32>
    %100 = tpu.matmul %98, %99, %cst_49 {dimension_numbers = #tpu.dot_dimension_numbers<[1], [0], [0], [1], [0, 0, 1, 1], [], []>} : vector<2x64xf32>, vector<64x120xf32>, vector<2x120xf32> -> vector<2x120xf32>
    %101 = arith.addf %97, %100 : vector<2x120xf32>
    %102 = vector.extract_strided_slice %91 {offsets = [4, 0], sizes = [2, 64], strides = [1, 1]} : vector<8x64xf32> to vector<2x64xf32>
    %c128 = arith.constant 128 : index
    %c0_50 = arith.constant 0 : index
    %103 = vector.load %arg10[%c128, %c0_50] : memref<256x120xf32, #tpu.memory_space<vmem>>, vector<64x120xf32>
    %cst_51 = arith.constant dense<0.000000e+00> : vector<2x120xf32>
    %104 = tpu.matmul %102, %103, %cst_51 {dimension_numbers = #tpu.dot_dimension_numbers<[1], [0], [0], [1], [0, 0, 1, 1], [], []>} : vector<2x64xf32>, vector<64x120xf32>, vector<2x120xf32> -> vector<2x120xf32>
    %105 = arith.addf %101, %104 : vector<2x120xf32>
    %106 = vector.extract_strided_slice %91 {offsets = [6, 0], sizes = [2, 64], strides = [1, 1]} : vector<8x64xf32> to vector<2x64xf32>
    %c192 = arith.constant 192 : index
    %c0_52 = arith.constant 0 : index
    %107 = vector.load %arg10[%c192, %c0_52] : memref<256x120xf32, #tpu.memory_space<vmem>>, vector<64x120xf32>
    %cst_53 = arith.constant dense<0.000000e+00> : vector<2x120xf32>
    %108 = tpu.matmul %106, %107, %cst_53 {dimension_numbers = #tpu.dot_dimension_numbers<[1], [0], [0], [1], [0, 0, 1, 1], [], []>} : vector<2x64xf32>, vector<64x120xf32>, vector<2x120xf32> -> vector<2x120xf32>
    %109 = arith.addf %105, %108 : vector<2x120xf32>
    %cst_54 = arith.constant 0.000000e+00 : f32
    %110 = vector.broadcast %cst_54 : f32 to vector<2x120xf32>
    %111 = arith.maximumf %109, %110 : vector<2x120xf32>
    %c0_55 = arith.constant 0 : index
    %c0_56 = arith.constant 0 : index
    %112 = vector.load %arg12[%c0_55, %c0_56] : memref<120x84xf32, #tpu.memory_space<vmem>>, vector<120x84xf32>
    %cst_57 = arith.constant dense<0.000000e+00> : vector<2x84xf32>
    %113 = tpu.matmul %111, %112, %cst_57 {dimension_numbers = #tpu.dot_dimension_numbers<[1], [0], [0], [1], [0, 0, 1, 1], [], []>} : vector<2x120xf32>, vector<120x84xf32>, vector<2x84xf32> -> vector<2x84xf32>
    %c0_58 = arith.constant 0 : index
    %c0_59 = arith.constant 0 : index
    %114 = vector.load %arg13[%c0_58, %c0_59] : memref<1x84xf32, #tpu.memory_space<vmem>>, vector<1x84xf32>
    %115 = vector.broadcast %114 : vector<1x84xf32> to vector<2x84xf32>
    %116 = arith.addf %113, %115 : vector<2x84xf32>
    %cst_60 = arith.constant 0.000000e+00 : f32
    %117 = vector.broadcast %cst_60 : f32 to vector<2x84xf32>
    %118 = arith.maximumf %116, %117 : vector<2x84xf32>
    %c0_61 = arith.constant 0 : index
    %c0_62 = arith.constant 0 : index
    %119 = vector.load %arg14[%c0_61, %c0_62] : memref<84x128xf32, #tpu.memory_space<vmem>>, vector<84x128xf32>
    %cst_63 = arith.constant dense<0.000000e+00> : vector<2x128xf32>
    %120 = tpu.matmul %118, %119, %cst_63 {dimension_numbers = #tpu.dot_dimension_numbers<[1], [0], [0], [1], [0, 0, 1, 1], [], []>} : vector<2x84xf32>, vector<84x128xf32>, vector<2x128xf32> -> vector<2x128xf32>
    %c0_64 = arith.constant 0 : index
    %c0_65 = arith.constant 0 : index
    %121 = vector.load %arg15[%c0_64, %c0_65] : memref<1x128xf32, #tpu.memory_space<vmem>>, vector<1x128xf32>
    %122 = vector.broadcast %121 : vector<1x128xf32> to vector<2x128xf32>
    %123 = arith.addf %120, %122 : vector<2x128xf32>
    %c0_66 = arith.constant 0 : index
    %c0_67 = arith.constant 0 : index
    %124 = vector.load %arg16[%c0_66, %c0_67] : memref<2x128xf32, #tpu.memory_space<vmem>>, vector<2x128xf32>
    tpu.vector_store %arg16[%c0_66, %c0_67], %123 {strides = array<i32>} : memref<2x128xf32, #tpu.memory_space<vmem>>, vector<2x128xf32>,
    return
  }
  func.func @transform_0(%arg0: i32) -> (i32, i32, i32) {
    %c0_i32 = arith.constant 0 : i32
    %c0_i32_0 = arith.constant 0 : i32
    %c0_i32_1 = arith.constant 0 : i32
    %c0_i32_2 = arith.constant 0 : i32
    return %c0_i32, %c0_i32_0, %c0_i32_1 : i32, i32, i32
  }
  func.func @transform_1(%arg0: i32) -> (i32, i32) {
    %c0_i32 = arith.constant 0 : i32
    %c0_i32_0 = arith.constant 0 : i32
    %c0_i32_1 = arith.constant 0 : i32
    return %c0_i32, %c0_i32_0 : i32, i32
  }
  func.func @transform_2(%arg0: i32) -> (i32, i32) {
    %c0_i32 = arith.constant 0 : i32
    %c0_i32_0 = arith.constant 0 : i32
    %c0_i32_1 = arith.constant 0 : i32
    return %c0_i32, %c0_i32_0 : i32, i32
  }
  func.func @transform_3(%arg0: i32) -> (i32, i32) {
    %c0_i32 = arith.constant 0 : i32
    %c0_i32_0 = arith.constant 0 : i32
    %c0_i32_1 = arith.constant 0 : i32
    return %c0_i32, %c0_i32_0 : i32, i32
  }
  func.func @transform_4(%arg0: i32) -> (i32, i32) {
    %c0_i32 = arith.constant 0 : i32
    %c0_i32_0 = arith.constant 0 : i32
    %c0_i32_1 = arith.constant 0 : i32
    return %c0_i32, %c0_i32_0 : i32, i32
  }
  func.func @transform_5(%arg0: i32) -> (i32, i32) {
    %c0_i32 = arith.constant 0 : i32
    %c0_i32_0 = arith.constant 0 : i32
    %c0_i32_1 = arith.constant 0 : i32
    return %c0_i32, %c0_i32_0 : i32, i32
  }
  func.func @transform_6(%arg0: i32) -> (i32, i32) {
    %c0_i32 = arith.constant 0 : i32
    %c0_i32_0 = arith.constant 0 : i32
    %c0_i32_1 = arith.constant 0 : i32
    return %c0_i32, %c0_i32_0 : i32, i32
  }
  func.func @transform_7(%arg0: i32) -> (i32, i32) {
    %c0_i32 = arith.constant 0 : i32
    %c0_i32_0 = arith.constant 0 : i32
    %c0_i32_1 = arith.constant 0 : i32
    return %c0_i32, %c0_i32_0 : i32, i32
  }
  func.func @transform_8(%arg0: i32) -> (i32, i32) {
    %c0_i32 = arith.constant 0 : i32
    %c0_i32_0 = arith.constant 0 : i32
    %c0_i32_1 = arith.constant 0 : i32
    return %c0_i32, %c0_i32_0 : i32, i32
  }
  func.func @transform_9(%arg0: i32) -> (i32, i32) {
    %c0_i32 = arith.constant 0 : i32
    %c0_i32_0 = arith.constant 0 : i32
    %c0_i32_1 = arith.constant 0 : i32
    return %c0_i32, %c0_i32_0 : i32, i32
  }
  func.func @transform_10(%arg0: i32) -> (i32, i32) {
    %c0_i32 = arith.constant 0 : i32
    %c0_i32_0 = arith.constant 0 : i32
    %c0_i32_1 = arith.constant 0 : i32
    return %c0_i32, %c0_i32_0 : i32, i32
  }
  func.func @transform_11(%arg0: i32) -> (i32, i32) {
    %c0_i32 = arith.constant 0 : i32
    %c0_i32_0 = arith.constant 0 : i32
    %c0_i32_1 = arith.constant 0 : i32
    return %c0_i32, %c0_i32_0 : i32, i32
  }
  func.func @transform_12(%arg0: i32) -> (i32, i32) {
    %c0_i32 = arith.constant 0 : i32
    %c0_i32_0 = arith.constant 0 : i32
    %c0_i32_1 = arith.constant 0 : i32
    return %c0_i32, %c0_i32_0 : i32, i32
  }
  func.func @transform_13(%arg0: i32) -> (i32, i32) {
    %c0_i32 = arith.constant 0 : i32
    %c0_i32_0 = arith.constant 0 : i32
    %c0_i32_1 = arith.constant 0 : i32
    return %c0_i32, %c0_i32_0 : i32, i32
  }
  func.func @transform_14(%arg0: i32) -> (i32, i32) {
    %c0_i32 = arith.constant 0 : i32
    %c0_i32_0 = arith.constant 0 : i32
    %c0_i32_1 = arith.constant 0 : i32
    return %c0_i32, %c0_i32_0 : i32, i32
  }
  func.func @transform_15(%arg0: i32) -> (i32, i32) {
    %c0_i32 = arith.constant 0 : i32
    %c0_i32_0 = arith.constant 0 : i32
    %c0_i32_1 = arith.constant 0 : i32
    return %c0_i32, %c0_i32_0 : i32, i32
  }
}

</mosaic_0001>

<bundles_post_ra>
// kernel: lenet_forward.1
= control target key start
LH: loop header
LB: loop body
LE: loop exit
PB: predicated region body
PF: predicated region fallthrough
CT: control target
= control target key end

     0   :  { %vm88_vm0 = vcmask 1043456   ;;  %v3014_v10 = vmov 0.0   ;;  %vm69_vm1 = vcmask 228352   ;;  %vm220_vm2 = vcmask 1046528   ;;  %s4144_s0 = inlined_call_operand.vmem [shape: f32[2,28,28], index: 0, kind: input, shape index: {}]   ;;  %s4145_s1 = inlined_call_operand.vmem [shape: f32[140,144], index: 1, kind: input, shape index: {}]   ;;  %s4146_s2 = inlined_call_operand.vmem [shape: f32[1,144], index: 2, kind: input, shape index: {}]   ;;  %s4147_s3 = inlined_call_operand.vmem [shape: f32[143,72], index: 3, kind: input, shape index: {}]   ;;  %s4148_s4 = inlined_call_operand.vmem [shape: f32[24,47], index: 4, kind: input, shape index: {}]   ;;  %s4149_s5 = inlined_call_operand.vmem [shape: f32[360,128], index: 5, kind: input, shape index: {}]   ;;  %s4150_s6 = inlined_call_operand.vmem [shape: f32[1,128], index: 6, kind: input, shape index: {}]   ;;  %s4151_s7 = inlined_call_operand.vmem [shape: f32[127,64], index: 7, kind: input, shape index: {}]   ;;  %s4152_s8 = inlined_call_operand.vmem [shape: f32[8,15], index: 8, kind: input, shape index: {}]   ;;  %s4153_s9 = inlined_call_operand.vmem [shape: f32[256,120], index: 9, kind: input, shape index: {}]   ;;  %s4154_s10 = inlined_call_operand.vmem [shape: f32[1,120], index: 10, kind: input, shape index: {}]   ;;  %s4155_s11 = inlined_call_operand.vmem [shape: f32[120,84], index: 11, kind: input, shape index: {}]   ;;  %s4156_s12 = inlined_call_operand.vmem [shape: f32[1,84], index: 12, kind: input, shape index: {}]   ;;  %s4157_s13 = inlined_call_operand.vmem [shape: f32[84,128], index: 13, kind: input, shape index: {}]   ;;  %s4158_s14 = inlined_call_operand.vmem [shape: f32[1,128], index: 14, kind: input, shape index: {}]   ;;  %s4159_s15 = inlined_call_operand.hbm [shape: f32[2,128], index: 15, kind: output, shape index: {}]  }
   0x1   :  { %v68_v0 = vld [vmem:[%s4145_s1 + $0x38] sm:$0xf]  ;;  %v67_v1 = vld [vmem:[%s4145_s1 + $0x30] sm:$0xf]  ;;  %v66_v2 = vld [vmem:[%s4145_s1 + $0x28] sm:$0xff]  ;;  %159 = vmatprep.mubr.f32.mxu0 %v3014_v10  ;;  %352 = vmatprep.mubr.f32.mxu1 %v3014_v10 }
   0x2   :  { %2460 = vmatprep.subr.msk.mxu0 %vm88_vm0, %v68_v0  ;;  %v243_v3 = vld [vmem:[%s4145_s1 + $0x68] sm:$0xff]  ;;  %v65_v4 = vld [vmem:[%s4145_s1 + $0x20] sm:$0xff]  ;;  %v64_v8 = vld [vmem:[%s4145_s1 + $0x18] sm:$0xff] }
   0x3   :  { %v242_v5 = vld [vmem:[%s4145_s1 + $0x60] sm:$0xff]  ;;  %2461 = vmatpush1.msk.msra.mxu0 %vm88_vm0, %v67_v1  ;;  %v264_v6 = vrot.slane %v243_v3, 4  ;;  %v241_v9 = vld [vmem:[%s4145_s1 + $0x58] sm:$0xff]  ;;  %v63_v12 = vld [vmem:[%s4145_s1 + $0x10] sm:$0xff] }
   0x4   :  { %v262_v7 = vrot.slane %v242_v5, 4  ;;  %121 = vmatprep.subr.mxu0 %v66_v2  ;;  %v260_v11 = vrot.slane %v241_v9, 4  ;;  %v240_v13 = vld [vmem:[%s4145_s1 + $0x50] sm:$0xff]  ;;  %v239_v14 = vld [vmem:[%s4145_s1 + $0x48] sm:$0xff]  ;;  %v238_v18 = vld [vmem:[%s4145_s1 + $0x40] sm:$0xff] }
   0x5   :  { %2468 = vmatprep.subr.msk.mxu1 %vm88_vm0, %v264_v6  ;;  %122 = vmatpush1.msra.mxu0 %v65_v4  ;;  %v258_v15 = vrot.slane %v240_v13, 4  ;;  %v62_v16 = vld [vmem:[%s4145_s1 + $0x8] sm:$0xff]  ;;  %v256_v17 = vrot.slane %v239_v14, 4  ;;  %v3145_v19 = vld [vmem:[%s4144_s0] sm:$0xff]  ;;  %v253_v22 = vrot.slane %v238_v18, 4  ;;  %v3168_v29 = vld [vmem:[%s4144_s0 + $0x10] sm:$0xff] }
   0x6   :  { %2469 = vmatpush1.msk.msra.mxu1 %vm88_vm0, %v262_v7  ;;  %123 = vmatprep.subr.mxu0 %v64_v8  ;;  %v265_v20 = vsel %vm88_vm0, %v260_v11, %v264_v6  ;;  %v61_v21 = vld [vmem:[%s4145_s1] sm:$0xff]  ;;  %v237_v23 = vld [vmem:[%s4145_s1 + $0x38] sm:$0xf0]  ;;  %v3158_v24 = vld [vmem:[%s4144_s0 + $0x8] sm:$0xff]  ;;  %v221_v32 = vrot.slane %v3145_v19, 1  ;;  %v224_v38 = vrot.slane %v3168_v29, 1 }
   0x7   :  { %314 = vmatprep.subr.mxu1 %v265_v20  ;;  %124 = vmatpush1.msra.mxu0 %v63_v12  ;;  %v263_v25 = vsel %vm88_vm0, %v258_v15, %v262_v7  ;;  %v261_v26 = vsel %vm88_vm0, %v256_v17, %v260_v11  ;;  %v255_v27 = vrot.slane %v237_v23, 4  ;;  %v236_v28 = vld [vmem:[%s4145_s1 + $0x30] sm:$0xf0]  ;;  %v259_v30 = vsel %vm88_vm0, %v253_v22, %v258_v15  ;;  %v423_v35 = vld [vmem:[%s4145_s1 + $0xa8] sm:$0xf]  ;;  %v577_v40 = vld [vmem:[%s4145_s1 + $0xd8] sm:$0xff] }
   0x8   :  { %315 = vmatpush1.msra.mxu1 %v263_v25  ;;  %125 = vmatprep.subr.mxu0 %v62_v16  ;;  %v252_v31 = vrot.slane %v236_v28, 4  ;;  %v222_v33 = vrot.slane %v3158_v24, 1  ;;  %v422_v39 = vld [vmem:[%s4145_s1 + $0xa0] sm:$0xf]  ;;  %v3192_v41 = vld [vmem:[%s4144_s0 + $0x18] sm:$0xf] }
   0x9   :  { %316 = vmatprep.subr.mxu1 %v261_v26  ;;  %126 = vmatpush1.msra.mxu0 %v61_v21  ;;  %v257_v34 = vsel %vm88_vm0, %v255_v27, %v256_v17  ;;  %v421_v42 = vld [vmem:[%s4145_s1 + $0x98] sm:$0xff]  ;;  %v598_v43 = vrot.slane %v577_v40, 4  ;;  %v576_v44 = vld [vmem:[%s4145_s1 + $0xd0] sm:$0xff]  ;;  %v575_v45 = vld [vmem:[%s4145_s1 + $0xc8] sm:$0xff]  ;;  %v226_v50 = vrot.slane %v3192_v41, 1 }
   0xa   :  { %317 = vmatpush1.msra.mxu1 %v259_v30  ;;  %2462 = vmatmul.mubr.msk.f32.vlgmr.msra.gmra.mxu0 %vm69_vm1, %v3145_v19  ;;  %v254_v36 = vsel %vm88_vm0, %v252_v31, %v253_v22  ;;  %v223_v37 = vsel %vm220_vm2, %v221_v32, %v222_v33  ;;  %v420_v46 = vld [vmem:[%s4145_s1 + $0x90] sm:$0xff]  ;;  %v594_v47 = vrot.slane %v575_v45, 4  ;;  %v574_v48 = vld [vmem:[%s4145_s1 + $0xc0] sm:$0xff]  ;;  %v225_v49 = vsel %vm220_vm2, %v222_v33, %v224_v38  ;;  %v419_v51 = vld [vmem:[%s4145_s1 + $0x88] sm:$0xff] }
   0xb   :  { %318 = vmatprep.subr.mxu1 %v257_v34  ;;  %165 = vmatprep.mubr.f32.mxu0 %v3014_v10  ;;  %v573_v52 = vld [vmem:[%s4145_s1 + $0xb8] sm:$0xff]  ;;  %v3227_v53 = vld [vmem:[%s4144_s0 + $0x20] sm:$0xff]  ;;  %v3232_v54 = vld [vmem:[%s4144_s0 + $0x28] sm:$0xff]  ;;  %v596_v55 = vrot.slane %v576_v44, 4  ;;  %v592_v56 = vrot.slane %v574_v48, 4  ;;  %v227_v61 = vsel %vm220_vm2, %v224_v38, %v226_v50 }
   0xc   :  { %319 = vmatpush1.msra.mxu1 %v254_v36  ;;  %2476 = vmatprep.subr.msk.mxu0 %vm88_vm0, %v423_v35  ;;  %v599_v57 = vsel %vm88_vm0, %v594_v47, %v598_v43  ;;  %v418_v58 = vld [vmem:[%s4145_s1 + $0x80] sm:$0xff]  ;;  %v590_v59 = vrot.slane %v573_v52, 4  ;;  %v572_v60 = vld [vmem:[%s4145_s1 + $0xb0] sm:$0xff]  ;;  %v229_v62 = vrot.slane %v3227_v53, 1  ;;  %v230_v63 = vrot.slane %v3232_v54, 1  ;;  %v417_v0 = vld [vmem:[%s4145_s1 + $0x78] sm:$0xff] }
   0xd   :  { %2470 = vmatmul.mubr.msk.f32.vlgmr.msra.gmra.mxu1 %vm69_vm1, %v223_v37  ;;  %2477 = vmatpush1.msk.msra.mxu0 %vm88_vm0, %v422_v39  ;;  %v571_v1 = vld [vmem:[%s4145_s1 + $0xa8] sm:$0xf0]  ;;  %v3259_v2 = vld [vmem:[%s4144_s0 + $0x30] sm:$0xff] }
   0xe   :  { %2463 = vmatmul.mubr.msk.f32.gmra.mxu0 %vm69_vm1, %v3158_v24  ;;  %358 = vmatprep.mubr.f32.mxu1 %v3014_v10 }
   0xf   :  { %171 = vmatprep.mubr.f32.mxu0 %v3014_v10  ;;  %468 = vmatprep.subr.mxu0 %v421_v42 }
  0x10   :  { %2484 = vmatprep.subr.msk.mxu1 %vm88_vm0, %v598_v43  ;;  %469 = vmatpush1.msra.mxu0 %v420_v46 }
  0x11   :  { %2471 = vmatmul.mubr.msk.f32.gmra.mxu1 %vm69_vm1, %v225_v49  ;;  %470 = vmatprep.subr.mxu0 %v419_v51 }
  0x12   :  { %2464 = vmatmul.mubr.msk.f32.gmra.mxu0 %vm69_vm1, %v3168_v29  ;;  %364 = vmatprep.mubr.f32.mxu1 %v3014_v10 }
  0x13   :  { %177 = vmatprep.mubr.f32.mxu0 %v3014_v10  ;;  %2485 = vmatpush1.msk.msra.mxu1 %vm88_vm0, %v596_v55 }
  0x14   :  { %20 = vsyncpa [#allocation3], 0  ;;  %648 = vmatprep.subr.mxu1 %v599_v57  ;;  %471 = vmatpush1.msra.mxu0 %v418_v58  ;;  %v597_v3 = vsel %vm88_vm0, %v592_v56, %v596_v55  ;;  %v587_v4 = vrot.slane %v572_v60, 4  ;;  %v595_v5 = vsel %vm88_vm0, %v590_v59, %v594_v47  ;;  %v416_v6 = vld [vmem:[%s4145_s1 + $0x70] sm:$0xff]  ;;  %v589_v7 = vrot.slane %v571_v1, 4  ;;  %v754_v31 = vld [vmem:[%s4145_s1 + $0x108] sm:$0xff] }
  0x15   :  { %2472 = vmatmul.mubr.msk.f32.gmra.mxu1 %vm69_vm1, %v227_v61  ;;  %472 = vmatprep.subr.mxu0 %v417_v0  ;;  %v570_v8 = vld [vmem:[%s4145_s1 + $0xa0] sm:$0xf0]  ;;  %v231_v9 = vsel %vm220_vm2, %v229_v62, %v230_v63  ;;  %v232_v11 = vrot.slane %v3259_v2, 1  ;;  %v756_v12 = vld [vmem:[%s4145_s1 + $0x118] sm:$0xf]  ;;  %v402_v20 = vrot.slane %v3145_v19, 2 }
  0x16   :  { %2465 = vmatmul.mubr.msk.f32.gmra.mxu0 %vm69_vm1, %v3227_v53  ;;  %370 = vmatprep.mubr.f32.mxu1 %v3014_v10  ;;  %v3283_v13 = vld [vmem:[%s4144_s0 + $0x38] sm:$0xf]  ;;  %v593_v14 = vsel %vm88_vm0, %v587_v4, %v592_v56  ;;  %v586_v15 = vrot.slane %v570_v8, 4  ;;  %v591_v16 = vsel %vm88_vm0, %v589_v7, %v590_v59  ;;  %v403_v21 = vrot.slane %v3158_v24, 2  ;;  %v755_v30 = vld [vmem:[%s4145_s1 + $0x110] sm:$0xf] }
  0x17   :  { %183 = vmatprep.mubr.f32.mxu0 %v3014_v10  ;;  %649 = vmatpush1.msra.mxu1 %v597_v3  ;;  %v233_v17 = vsel %vm220_vm2, %v230_v63, %v232_v11  ;;  %v234_v18 = vrot.slane %v3283_v13, 1  ;;  %vm401_vm3 = vcmask 1045504   ;;  %v556_v23 = vrot.slane %v3145_v19, 3  ;;  %v753_v34 = vld [vmem:[%s4145_s1 + $0x100] sm:$0xff]  ;;  %v752_v37 = vld [vmem:[%s4145_s1 + $0xf8] sm:$0xff]  ;;  %v751_v38 = vld [vmem:[%s4145_s1 + $0xf0] sm:$0xff] }
  0x18   :  { %650 = vmatprep.subr.mxu1 %v595_v5  ;;  %473 = vmatpush1.msra.mxu0 %v416_v6  ;;  %v588_v22 = vsel %vm88_vm0, %v586_v15, %v587_v4  ;;  %v557_v26 = vrot.slane %v3158_v24, 3  ;;  %v404_v27 = vsel %vm401_vm3, %v402_v20, %v403_v21  ;;  %vm555_vm4 = vcmask 1044480   ;;  %v750_v42 = vld [vmem:[%s4145_s1 + $0xe8] sm:$0xff]  ;;  %v749_v46 = vld [vmem:[%s4145_s1 + $0xe0] sm:$0xff]  ;;  %v974_v15 = vld [vmem:[%s4147_s3 + $0x38] sm:$0xff]  ;;  %s3017_s21 = smov [#allocation2]  }
  0x19   :  { %2473 = vmatmul.mubr.msk.f32.gmra.mxu1 %vm69_vm1, %v231_v9  ;;  %2492 = vmatprep.subr.msk.mxu0 %vm88_vm0, %v756_v12  ;;  %v235_v25 = vsel %vm220_vm2, %v232_v11, %v234_v18  ;;  %v405_v28 = vrot.slane %v3168_v29, 2  ;;  %v559_v33 = vrot.slane %v3168_v29, 3  ;;  %v407_v36 = vrot.slane %v3192_v41, 2  ;;  %v980_v8 = vld [vmem:[%s4147_s3 + $0x68] sm:$0xff]  ;;  %v979_v9 = vld [vmem:[%s4147_s3 + $0x60] sm:$0xff]  ;;  %v978_v11 = vld [vmem:[%s4147_s3 + $0x58] sm:$0xff] }
  0x1a   :  { %2466 = vmatmul.mubr.msk.f32.gmra.mxu0 %vm69_vm1, %v3232_v54  ;;  %376 = vmatprep.mubr.f32.mxu1 %v3014_v10  ;;  %v558_v32 = vsel %vm555_vm4, %v556_v23, %v557_v26  ;;  %v561_v40 = vrot.slane %v3192_v41, 3  ;;  %v409_v44 = vrot.slane %v3227_v53, 2  ;;  %v410_v45 = vrot.slane %v3232_v54, 2  ;;  %v977_v12 = vld [vmem:[%s4147_s3 + $0x50] sm:$0xff]  ;;  %v971_v18 = vld [vmem:[%s4147_s3 + $0x20] sm:$0xff]  ;;  %v970_v20 = vld [vmem:[%s4147_s3 + $0x18] sm:$0xff] }
  0x1b   :  { %189 = vmatprep.mubr.f32.mxu0 %v3014_v10  ;;  %651 = vmatpush1.msra.mxu1 %v593_v14  ;;  %v406_v35 = vsel %vm401_vm3, %v403_v21, %v405_v28  ;;  %v560_v39 = vsel %vm555_vm4, %v557_v26, %v559_v33  ;;  %v408_v43 = vsel %vm401_vm3, %v405_v28, %v407_v36  ;;  %v563_v48 = vrot.slane %v3227_v53, 3  ;;  %v975_v14 = vld [vmem:[%s4147_s3 + $0x40] sm:$0xff]  ;;  %v969_v21 = vld [vmem:[%s4147_s3 + $0x10] sm:$0xff] }
  0x1c   :  { %652 = vmatprep.subr.mxu1 %v591_v16  ;;  %v562_v47 = vsel %vm555_vm4, %v559_v33, %v561_v40  ;;  %v564_v49 = vrot.slane %v3232_v54, 3  ;;  %v411_v50 = vsel %vm401_vm3, %v409_v44, %v410_v45  ;;  %v412_v51 = vrot.slane %v3259_v2, 2  ;;  %v973_v16 = vld [vmem:[%s4147_s3 + $0x30] sm:$0xff] }
  0x1d   :  { %2474 = vmatmul.mubr.msk.f32.gmra.mxu1 %vm69_vm1, %v233_v17  ;;  %v566_v55 = vrot.slane %v3259_v2, 3  ;;  %v414_v57 = vrot.slane %v3283_v13, 2  ;;  %v568_v59 = vrot.slane %v3283_v13, 3  ;;  %v735_v60 = vrot.slane %v3145_v19, 4  ;;  %v972_v17 = vld [vmem:[%s4147_s3 + $0x28] sm:$0xff] }
  0x1e   :  { %2467 = vmatmul.mubr.msk.f32.gmra.mxu0 %vm69_vm1, %v3259_v2  ;;  %382 = vmatprep.mubr.f32.mxu1 %v3014_v10  ;;  %v565_v52 = vsel %vm555_vm4, %v563_v48, %v564_v49  ;;  %v413_v56 = vsel %vm401_vm3, %v410_v45, %v412_v51  ;;  %v736_v62 = vrot.slane %v3158_v24, 4  ;;  %v738_v19 = vrot.slane %v3168_v29, 4 }
  0x1f   :  { %506 = vmatprep.mubr.f32.mxu0 %v3014_v10  ;;  %653 = vmatpush1.msra.mxu1 %v588_v22  ;;  %v567_v58 = vsel %vm555_vm4, %v564_v49, %v566_v55  ;;  %v415_v61 = vsel %vm401_vm3, %v412_v51, %v414_v57  ;;  %v569_v63 = vsel %vm555_vm4, %v566_v55, %v568_v59  ;;  %v740_v1 = vrot.slane %v3192_v41, 4  ;;  %v60_v59 = vld [vmem:[%s4146_s2] sm:$0x3] }
  0x20   :  { %1007 = vmatprep.subr.mxu1 %v3014_v10  ;;  %v737_v0 = vsel %vm88_vm0, %v735_v60, %v736_v62  ;;  %v739_v24 = vsel %vm88_vm0, %v736_v62, %v738_v19  ;;  %v742_v4 = vrot.slane %v3227_v53, 4  ;;  %v743_v29 = vrot.slane %v3232_v54, 4  ;;  %v982_v54 = vld [vmem:[%s4147_s3 + $0x78] sm:$0xff] }
  0x21   :  { %2475 = vmatmul.mubr.msk.f32.gmra.mxu1 %vm69_vm1, %v235_v25  ;;  %v741_v3 = vsel %vm88_vm0, %v738_v19, %v740_v1  ;;  %v745_v6 = vrot.slane %v3259_v2, 4  ;;  %v747_v7 = vrot.slane %v3283_v13, 4  ;;  %v981_v2 = vld [vmem:[%s4147_s3 + $0x70] sm:$0xff]  ;;  %v976_v13 = vld [vmem:[%s4147_s3 + $0x48] sm:$0xff]  ;;  %v197_v45 = vlaneseq }
  0x22   :  { %2478 = vmatmul.mubr.msk.f32.vlgmr.msra.gmra.mxu0 %vm69_vm1, %v404_v27  ;;  %686 = vmatprep.mubr.f32.mxu1 %v3014_v10  ;;  %v744_v5 = vsel %vm88_vm0, %v742_v4, %v743_v29  ;;  %vm936_vm5 = vcmask 1039360   ;;  %vm985_vm6 = vcmask 121856   ;;  %vm3016_vm7 = vmmov 0  }
  0x23   :  { %512 = vmatprep.mubr.f32.mxu0 %v3014_v10  ;;  %2493 = vmatpush1.msk.msra.mxu0 %vm88_vm0, %v755_v30  ;;  %v746_v41 = vsel %vm88_vm0, %v743_v29, %v745_v6  ;;  %v748_v53 = vsel %vm88_vm0, %v745_v6, %v747_v7  ;;  %v967_v7 = vld [vmem:[%s4147_s3] sm:$0xff]  ;;  %vm1134_vm8 = vcmask 384000   ;;  %vm1242_vm9 = vcmask 588800  }
  0x24   :  { %801 = vmatprep.subr.mxu0 %v754_v31  ;;  %vm1334_vm10 = vcmask 1042432   ;;  %vm1431_vm11 = vcmask 1041408   ;;  %vm1528_vm12 = vcmask 1040384   ;;  %vm1921_vm13 = vcmask 523264  }
  0x25   :  { %2486 = vmatmul.mubr.msk.f32.vlgmr.msra.gmra.mxu1 %vm69_vm1, %v558_v32  ;;  %802 = vmatpush1.msra.mxu0 %v753_v34  ;;  %vm2271_vm14 = vcmask 982016   ;;  %vm2364_vm15 = vcmask 687104  }
  0x26   :  { %2479 = vmatmul.mubr.msk.f32.gmra.mxu0 %vm69_vm1, %v406_v35  ;;  %692 = vmatprep.mubr.f32.mxu1 %v3014_v10 }
  0x27   :  { %518 = vmatprep.mubr.f32.mxu0 %v3014_v10  ;;  %803 = vmatprep.subr.mxu0 %v752_v37 }
  0x28   :  { %804 = vmatpush1.msra.mxu0 %v751_v38  ;;  %1008 = vmatpush1.msra.mxu1 %v982_v54 }
  0x29   :  { %2487 = vmatmul.mubr.msk.f32.gmra.mxu1 %vm69_vm1, %v560_v39  ;;  %805 = vmatprep.subr.mxu0 %v750_v42 }
  0x2a   :  { %2480 = vmatmul.mubr.msk.f32.gmra.mxu0 %vm69_vm1, %v408_v43  ;;  %698 = vmatprep.mubr.f32.mxu1 %v3014_v10 }
  0x2b   :  { %524 = vmatprep.mubr.f32.mxu0 %v3014_v10  ;;  %806 = vmatpush1.msra.mxu0 %v749_v46 }
  0x2c   :  { %2686 = vmatprep.subr.mxu0 %v3014_v10  ;;  %1009 = vmatprep.subr.mxu1 %v3014_v10 }
  0x2d   :  { %2488 = vmatmul.mubr.msk.f32.gmra.mxu1 %vm69_vm1, %v562_v47 }
  0x2e   :  { %2481 = vmatmul.mubr.msk.f32.gmra.mxu0 %vm69_vm1, %v411_v50  ;;  %704 = vmatprep.mubr.f32.mxu1 %v3014_v10  ;;  %v198_v50 = vshrl.u32 %v197_v45, 7 }
  0x2f   :  { %530 = vmatprep.mubr.f32.mxu0 %v3014_v10  ;;  %1010 = vmatpush1.msra.mxu1 %v981_v2 }
  0x30   :  { %1011 = vmatprep.subr.mxu1 %v3014_v10  ;;  %v199_v57 = vsub.s32 0, %v198_v50 }
  0x31   :  { %2489 = vmatmul.mubr.msk.f32.gmra.mxu1 %vm69_vm1, %v565_v52 }
  0x32   :  { %2482 = vmatmul.mubr.msk.f32.gmra.mxu0 %vm69_vm1, %v413_v56  ;;  %710 = vmatprep.mubr.f32.mxu1 %v3014_v10 }
  0x33   :  { %536 = vmatprep.mubr.f32.mxu0 %v3014_v10  ;;  %1012 = vmatpush1.msra.mxu1 %v980_v8 }
  0x34   :  { %1013 = vmatprep.subr.mxu1 %v3014_v10 }
  0x35   :  { %2490 = vmatmul.mubr.msk.f32.gmra.mxu1 %vm69_vm1, %v567_v58 }
  0x36   :  { %2483 = vmatmul.mubr.msk.f32.gmra.mxu0 %vm69_vm1, %v415_v61  ;;  %716 = vmatprep.mubr.f32.mxu1 %v3014_v10  ;;  %v203_v61 = vsub.s32 1, %v198_v50 }
  0x37   :  { %839 = vmatprep.mubr.f32.mxu0 %v3014_v10  ;;  %1014 = vmatpush1.msra.mxu1 %v979_v9 }
  0x38   :  { %1015 = vmatprep.subr.mxu1 %v3014_v10  ;;  %v3493_v1 = vrot.slane %v60_v59, %v203_v61 }
  0x39   :  { %2491 = vmatmul.mubr.msk.f32.gmra.mxu1 %vm69_vm1, %v569_v63 }
  0x3a   :  { %2494 = vmatmul.mubr.msk.f32.vlgmr.msra.gmra.mxu0 %vm69_vm1, %v737_v0  ;;  %1016 = vmatpush1.msra.mxu1 %v978_v11  ;;  %v3491_v0 = vrot.slane %v60_v59, %v199_v57 }
  0x3b   :  { %845 = vmatprep.mubr.f32.mxu0 %v3014_v10  ;;  %1017 = vmatprep.subr.mxu1 %v3014_v10 }
  0x3c   :  { %1018 = vmatpush1.msra.mxu1 %v977_v12 }
  0x3d   :  { %1019 = vmatprep.subr.mxu1 %v3014_v10 }
  0x3e   :  { %2495 = vmatmul.mubr.msk.f32.gmra.mxu0 %vm69_vm1, %v739_v24  ;;  %1020 = vmatpush1.msra.mxu1 %v976_v13 }
  0x3f   :  { %851 = vmatprep.mubr.f32.mxu0 %v3014_v10  ;;  %1021 = vmatprep.subr.mxu1 %v3014_v10 }
  0x40   :  { %1022 = vmatpush1.msra.mxu1 %v975_v14 }
  0x41   :  { %1023 = vmatprep.subr.mxu1 %v3014_v10 }
  0x42   :  { %2496 = vmatmul.mubr.msk.f32.gmra.mxu0 %vm69_vm1, %v741_v3  ;;  %1024 = vmatpush1.msra.mxu1 %v974_v15 }
  0x43   :  { %857 = vmatprep.mubr.f32.mxu0 %v3014_v10  ;;  %1025 = vmatprep.subr.mxu1 %v3014_v10 }
  0x44   :  { %1026 = vmatpush1.msra.mxu1 %v973_v16  ;;  %v984_v16 = vld [vmem:[%s4147_s3 + $0x88] sm:$0x7f] }
  0x45   :  { %1027 = vmatprep.subr.mxu1 %v3014_v10 }
  0x46   :  { %2497 = vmatmul.mubr.msk.f32.gmra.mxu0 %vm69_vm1, %v744_v5  ;;  %1028 = vmatpush1.msra.mxu1 %v972_v17 }
  0x47   :  { %863 = vmatprep.mubr.f32.mxu0 %v3014_v10  ;;  %1029 = vmatprep.subr.mxu1 %v3014_v10 }
  0x48   :  { %1030 = vmatpush1.msra.mxu1 %v971_v18 }
  0x49   :  { %1031 = vmatprep.subr.mxu1 %v3014_v10 }
  0x4a   :  { %2498 = vmatmul.mubr.msk.f32.gmra.mxu0 %vm69_vm1, %v746_v41  ;;  %1032 = vmatpush1.msra.mxu1 %v970_v20  ;;  %v968_v41 = vld [vmem:[%s4147_s3 + $0x8] sm:$0xff]  ;;  %v983_v20 = vld [vmem:[%s4147_s3 + $0x80] sm:$0xff]  ;;  %s3015_s3 = smov 127  }
  0x4b   :  { %869 = vmatprep.mubr.f32.mxu0 %v3014_v10  ;;  %1033 = vmatprep.subr.mxu1 %v3014_v10 }
  0x4c   :  { %1034 = vmatpush1.msra.mxu1 %v969_v21 }
  0x4d   :  { %1035 = vmatprep.subr.mxu1 %v3014_v10 }
  0x4e   :  { %2499 = vmatmul.mubr.msk.f32.gmra.mxu0 %vm69_vm1, %v748_v53  ;;  %1036 = vmatpush1.msra.mxu1 %v968_v41 }
  0x4f   :  { %1037 = vmatprep.subr.mxu1 %v3014_v10  ;;  %2698 = vmatprep.mubr.msk.f32.mxu0 %vm3016_vm7, %v3014_v10 }
  0x50   :  { %1038 = vmatpush1.msra.mxu1 %v967_v7 }
  0x51   :  { %1067 = vmatprep.subr.mxu1 %v3014_v10 }
  0x52   :  { %2500 = vmatpush2.msk.msra.mxu1 %vm220_vm2, %v984_v16 }
  0x53   :  { %1069 = vmatprep.subr.mxu1 %v3014_v10 }
  0x54   :  { %1070 = vmatpush2.msra.mxu1 %v983_v20 }
  0xca   :  { %v161_v22 = vpop.f32.mrf.mxu0 }
  0xcb   :  { %v207_v4 = vadd.f32 %v3491_v0, %v161_v22 }
  0xcc   :  { %v163_v23 = vpop.f32.mrf.mxu0 }
  0xcd   :  { %v354_v25 = vpop.f32.mrf.mxu1  ;;  %v208_v6 = vadd.f32 %v3493_v1, %v163_v23 }
  0xce   :  { %v167_v26 = vpop.f32.mrf.mxu0  ;;  %v389_v54 = vadd.f32 %v354_v25, %v207_v4 }
  0xcf   :  { %v356_v27 = vpop.f32.mrf.mxu1  ;;  %v209_v2 = vadd.f32 %v3491_v0, %v167_v26 }
  0xd0   :  { %v169_v28 = vpop.f32.mrf.mxu0  ;;  %v390_v11 = vadd.f32 %v356_v27, %v208_v6 }
  0xd1   :  { %v360_v30 = vpop.f32.mrf.mxu1  ;;  %v210_v12 = vadd.f32 %v3493_v1, %v169_v28 }
  0xd2   :  { %v173_v31 = vpop.f32.mrf.mxu0  ;;  %v391_v17 = vadd.f32 %v360_v30, %v209_v2 }
  0xd3   :  { %v362_v32 = vpop.f32.mrf.mxu1  ;;  %v211_v14 = vadd.f32 %v3491_v0, %v173_v31 }
  0xd4   :  { %v175_v33 = vpop.f32.mrf.mxu0  ;;  %v392_v23 = vadd.f32 %v362_v32, %v210_v12 }
  0xd5   :  { %v3460_v34 = vpop.f32.mrf.mxu1  ;;  %v212_v25 = vadd.f32 %v3493_v1, %v175_v33 }
  0xd6   :  { %v3462_v35 = vpop.f32.mrf.mxu0  ;;  %v393_v28 = vadd.f32 %v3460_v34, %v211_v14 }
  0xd7   :  { %v3464_v36 = vpop.f32.mrf.mxu1  ;;  %v213_v31 = vadd.f32 %v3491_v0, %v3462_v35 }
  0xd8   :  { %v3466_v37 = vpop.f32.mrf.mxu0  ;;  %v394_v33 = vadd.f32 %v3464_v36, %v212_v25 }
  0xd9   :  { %v3468_v38 = vpop.f32.mrf.mxu1 }
  0xda   :  { %v3470_v39 = vpop.f32.mrf.mxu0 }
  0xdb   :  { %v3472_v40 = vpop.f32.mrf.mxu1  ;;  %v215_v35 = vadd.f32 %v3491_v0, %v3470_v39 }
  0xdc   :  { %v3474_v42 = vpop.f32.mrf.mxu0 }
  0xdd   :  { %v3476_v43 = vpop.f32.mrf.mxu1 }
  0xde   :  { %v3478_v44 = vpop.f32.mrf.mxu0  ;;  %v397_v7 = vadd.f32 %v3476_v43, %v215_v35 }
  0xdf   :  { %v3480_v46 = vpop.f32.mrf.mxu1 }
  0xe0   :  { %v3482_v47 = vpop.f32.mrf.mxu0 }
  0xe1   :  { %v3484_v48 = vpop.f32.mrf.mxu1  ;;  %v218_v43 = vadd.f32 %v3493_v1, %v3482_v47 }
  0xe2   :  { %v508_v49 = vpop.f32.mrf.mxu0 }
  0xe3   :  { %v3486_v51 = vpop.f32.mrf.mxu1  ;;  %v543_v13 = vadd.f32 %v508_v49, %v389_v54  ;;  %v217_v54 = vadd.f32 %v3491_v0, %v3478_v44 }
  0xe4   :  { %v510_v52 = vpop.f32.mrf.mxu0  ;;  %v400_v47 = vadd.f32 %v3486_v51, %v218_v43 }
  0xe5   :  { %v688_v55 = vpop.f32.mrf.mxu1  ;;  %v544_v18 = vadd.f32 %v510_v52, %v390_v11  ;;  %v214_v52 = vadd.f32 %v3493_v1, %v3466_v37  ;;  %v216_v37 = vadd.f32 %v3493_v1, %v3474_v42  ;;  %v399_v14 = vadd.f32 %v3484_v48, %v217_v54 }
  0xe6   :  { %v514_v56 = vpop.f32.mrf.mxu0  ;;  %v723_v26 = vadd.f32 %v688_v55, %v543_v13 }
  0xe7   :  { %v690_v58 = vpop.f32.mrf.mxu1  ;;  %v545_v27 = vadd.f32 %v514_v56, %v391_v17  ;;  %v396_v36 = vadd.f32 %v3472_v40, %v214_v52 }
  0xe8   :  { %v516_v60 = vpop.f32.mrf.mxu0  ;;  %v724_v45 = vadd.f32 %v690_v58, %v544_v18 }
  0xe9   :  { %v694_v62 = vpop.f32.mrf.mxu1  ;;  %v546_v49 = vadd.f32 %v516_v60, %v392_v23  ;;  %v395_v60 = vadd.f32 %v3468_v38, %v213_v31 }
  0xea   :  { %v520_v63 = vpop.f32.mrf.mxu0  ;;  %v725_v55 = vadd.f32 %v694_v62, %v545_v27 }
  0xeb   :  { %v696_v19 = vpop.f32.mrf.mxu1  ;;  %v547_v57 = vadd.f32 %v520_v63, %v393_v28 }
  0xec   :  { %v522_v24 = vpop.f32.mrf.mxu0  ;;  %v726_v61 = vadd.f32 %v696_v19, %v546_v49 }
  0xed   :  { %v700_v29 = vpop.f32.mrf.mxu1  ;;  %v548_v4 = vadd.f32 %v522_v24, %v394_v33 }
  0xee   :  { %v526_v3 = vpop.f32.mrf.mxu0  ;;  %v727_v62 = vadd.f32 %v700_v29, %v547_v57 }
  0xef   :  { %v702_v8 = vpop.f32.mrf.mxu1  ;;  %v549_v41 = vadd.f32 %v526_v3, %v395_v60  ;;  %v398_v3 = vadd.f32 %v3480_v46, %v216_v37 }
  0xf0   :  { %v3496_v5 = vpop.f32.mrf.mxu0  ;;  %v728_v40 = vadd.f32 %v702_v8, %v548_v4 }
  0xf1   :  { %v706_v21 = vpop.f32.mrf.mxu1  ;;  %v550_v11 = vadd.f32 %v3496_v5, %v396_v36 }
  0xf2   :  { %v3505_v53 = vpop.f32.mrf.mxu0  ;;  %v729_v5 = vadd.f32 %v706_v21, %v549_v41 }
  0xf3   :  { %v708_v32 = vpop.f32.mrf.mxu1  ;;  %v551_v44 = vadd.f32 %v3505_v53, %v397_v7 }
  0xf4   :  { %v3509_v9 = vpop.f32.mrf.mxu0  ;;  %v730_v17 = vadd.f32 %v708_v32, %v550_v11 }
  0xf5   :  { %v712_v63 = vpop.f32.mrf.mxu1  ;;  %v552_v18 = vadd.f32 %v3509_v9, %v398_v3 }
  0xf6   :  { %v3514_v15 = vpop.f32.mrf.mxu0  ;;  %v731_v1 = vadd.f32 %v712_v63, %v551_v44 }
  0xf7   :  { %v714_v0 = vpop.f32.mrf.mxu1  ;;  %v553_v21 = vadd.f32 %v3514_v15, %v399_v14  ;;  %v1239_v14 = vld [vmem:[%s4149_s5 + $0x30] sm:$0xff] }
  0xf8   :  { %v3523_v22 = vpop.f32.mrf.mxu0 }
  0xf9   :  { %v718_v53 = vpop.f32.mrf.mxu1  ;;  %v554_v27 = vadd.f32 %v3523_v22, %v400_v47 }
  0xfa   :  { %v841_v30 = vpop.f32.mrf.mxu0  ;;  %v733_v31 = vadd.f32 %v718_v53, %v553_v21 }
  0xfb   :  { %v3530_v50 = vadd.f32 %v841_v30, %v723_v26  ;;  %v732_v26 = vadd.f32 %v714_v0, %v552_v18  ;;  %v720_v30 = vpop.f32.mrf.mxu1 }
  0xfc   :  { %v843_v59 = vpop.f32.mrf.mxu0  ;;  %v734_v57 = vadd.f32 %v720_v30, %v554_v27 }
  0xfd   :  { %v888_v56 = vmax.f32 %v3530_v50, 0.0  ;;  %v3536_v34 = vadd.f32 %v843_v59, %v724_v45 }
  0xfe   :  { %v847_v58 = vpop.f32.mrf.mxu0 }
  0xff   :  { %v3541_v6 = vadd.f32 %v847_v58, %v725_v55  ;;  %912 = vrot.lane.b32.xlu0 %v888_v56, %s3015_s3  ;;  %v889_v38 = vmax.f32 %v3536_v34, 0.0 }
 0x100   :  { %v849_v39 = vpop.f32.mrf.mxu0 }
 0x101   :  { %v890_v19 = vmax.f32 %v3541_v6, 0.0  ;;  %v3551_v24 = vadd.f32 %v849_v39, %v726_v61 }
 0x102   :  { %v853_v2 = vpop.f32.mrf.mxu0 }
 0x103   :  { %v3557_v42 = vadd.f32 %v853_v2, %v727_v62  ;;  %914 = vrot.lane.b32.xlu0 %v889_v38, %s3015_s3  ;;  %916 = vrot.lane.b32.xlu1 %v890_v19, %s3015_s3  ;;  %v891_v8 = vmax.f32 %v3551_v24, 0.0 }
 0x104   :  { %v855_v29 = vpop.f32.mrf.mxu0 }
 0x105   :  { %v892_v12 = vmax.f32 %v3557_v42, 0.0  ;;  %v881_v13 = vadd.f32 %v855_v29, %v728_v40 }
 0x106   :  { %v859_v16 = vpop.f32.mrf.mxu0 }
 0x107   :  { %v3573_v46 = vadd.f32 %v859_v16, %v729_v5  ;;  %918 = vrot.lane.b32.xlu1 %v891_v8, %s3015_s3  ;;  %920 = vrot.lane.b32.xlu0 %v892_v12, %s3015_s3  ;;  %v893_v48 = vmax.f32 %v881_v13, 0.0  ;;  %v1240_v13 = vld [vmem:[%s4149_s5 + $0x38] sm:$0xff]  ;;  %v1238_v16 = vld [vmem:[%s4149_s5 + $0x28] sm:$0xff] }
 0x108   :  { %v861_v20 = vpop.f32.mrf.mxu0 }
 0x109   :  { %v894_v23 = vmax.f32 %v3573_v46, 0.0  ;;  %v883_v25 = vadd.f32 %v861_v20, %v730_v17 }
 0x10a   :  { %v865_v9 = vpop.f32.mrf.mxu0 }
 0x10b   :  { %v884_v28 = vadd.f32 %v865_v9, %v731_v1  ;;  %922 = vrot.lane.b32.xlu1 %v893_v48, %s3015_s3  ;;  %924 = vrot.lane.b32.xlu0 %v894_v23, %s3015_s3  ;;  %v895_v45 = vmax.f32 %v883_v25, 0.0 }
 0x10c   :  { %v867_v51 = vpop.f32.mrf.mxu0 }
 0x10d   :  { %v896_v49 = vmax.f32 %v884_v28, 0.0  ;;  %v885_v52 = vadd.f32 %v867_v51, %v732_v26 }
 0x10e   :  { %v871_v15 = vpop.f32.mrf.mxu0 }
 0x10f   :  { %v886_v32 = vadd.f32 %v871_v15, %v733_v31  ;;  %926 = vrot.lane.b32.xlu1 %v895_v45, %s3015_s3  ;;  %928 = vrot.lane.b32.xlu0 %v896_v49, %s3015_s3  ;;  %v897_v22 = vmax.f32 %v885_v52, 0.0 }
 0x110   :  { %v873_v59 = vpop.f32.mrf.mxu0 }
 0x111   :  { %v898_v33 = vmax.f32 %v886_v32, 0.0  ;;  %v887_v55 = vadd.f32 %v873_v59, %v734_v57 }
 0x113   :  { %930 = vrot.lane.b32.xlu1 %v897_v22, %s3015_s3  ;;  %932 = vrot.lane.b32.xlu0 %v898_v33, %s3015_s3  ;;  %v899_v35 = vmax.f32 %v887_v55, 0.0 }
 0x117   :  { %934 = vrot.lane.b32.xlu1 %v899_v35, %s3015_s3 }
 0x171   :  { %v913_v58 = vpop.permute.xlu0 %912 }
 0x175   :  { %v915_v60 = vpop.permute.xlu0 %914  ;;  %v917_v61 = vpop.permute.xlu1 %916 }
 0x176   :  { %v937_v4 = vsel %vm936_vm5, %v913_v58, %v915_v60  ;;  %v956_v36 = vmax.f32 %v889_v38, %v915_v60  ;;  %v1131_v58 = vld [vmem:[%s4148_s4] sm:$0xff]  ;;  %v1346_v60 = vld [vmem:[%s4149_s5 + $0x88] sm:$0xff] }
 0x177   :  { %v955_v37 = vmax.f32 %v888_v56, %v937_v4  ;;  %v1132_v4 = vld [vmem:[%s4148_s4 + $0x8] sm:$0xff] }
 0x178   :  { %2501 = vmatprep.mubr.msk.f32.mxu1 %vm985_vm6, %v956_v36  ;;  %v1344_v36 = vld [vmem:[%s4149_s5 + $0x78] sm:$0xff] }
 0x179   :  { %1072 = vmatmul.mubr.f32.vlgmr.msra.gmra.mxu1 %v955_v37  ;;  %v919_v62 = vpop.permute.xlu1 %918  ;;  %v921_v63 = vpop.permute.xlu0 %920  ;;  %v1343_v37 = vld [vmem:[%s4149_s5 + $0x70] sm:$0xff] }
 0x17a   :  { %v938_v39 = vsel %vm936_vm5, %v917_v61, %v919_v62  ;;  %v958_v41 = vmax.f32 %v891_v8, %v919_v62  ;;  %v1345_v61 = vld [vmem:[%s4149_s5 + $0x80] sm:$0xff]  ;;  %v1133_v62 = vld [vmem:[%s4148_s4 + $0x10] sm:$0xff] }
 0x17b   :  { %v957_v24 = vmax.f32 %v890_v19, %v938_v39  ;;  %v1342_v39 = vld [vmem:[%s4149_s5 + $0x68] sm:$0xff] }
 0x17c   :  { %2502 = vmatprep.mubr.msk.f32.mxu1 %vm985_vm6, %v958_v41  ;;  %v1236_v41 = vld [vmem:[%s4149_s5 + $0x18] sm:$0xff] }
 0x17d   :  { %1077 = vmatmul.mubr.f32.gmra.mxu1 %v957_v24  ;;  %v923_v7 = vpop.permute.xlu1 %922  ;;  %v925_v34 = vpop.permute.xlu0 %924  ;;  %v1341_v24 = vld [vmem:[%s4149_s5 + $0x60] sm:$0xff] }
 0x17e   :  { %v939_v38 = vsel %vm936_vm5, %v921_v63, %v923_v7  ;;  %v960_v50 = vmax.f32 %v893_v48, %v923_v7  ;;  %v1237_v63 = vld [vmem:[%s4149_s5 + $0x20] sm:$0xff]  ;;  %v1235_v7 = vld [vmem:[%s4149_s5 + $0x10] sm:$0xff] }
 0x17f   :  { %v959_v56 = vmax.f32 %v892_v12, %v939_v38  ;;  %v1241_v12 = vld [vmem:[%s4149_s5 + $0x40] sm:$0xff]  ;;  %v1234_v38 = vld [vmem:[%s4149_s5 + $0x8] sm:$0xff] }
 0x180   :  { %2503 = vmatprep.mubr.msk.f32.mxu1 %vm985_vm6, %v960_v50  ;;  %2707 = vmatprep.subr.mxu1 %v1241_v12  ;;  %v1339_v50 = vld [vmem:[%s4149_s5 + $0x50] sm:$0xff] }
 0x181   :  { %1082 = vmatmul.mubr.f32.gmra.mxu1 %v959_v56  ;;  %v927_v54 = vpop.permute.xlu1 %926  ;;  %v929_v19 = vpop.permute.xlu0 %928  ;;  %v1233_v56 = vld [vmem:[%s4149_s5] sm:$0xff] }
 0x182   :  { %v940_v2 = vsel %vm936_vm5, %v925_v34, %v927_v54  ;;  %v962_v40 = vmax.f32 %v895_v45, %v927_v54  ;;  %2708 = vmatpush3.msra.mxu1 %v1241_v12  ;;  %v1340_v34 = vld [vmem:[%s4149_s5 + $0x58] sm:$0xff]  ;;  %v1338_v54 = vld [vmem:[%s4149_s5 + $0x48] sm:$0xff] }
 0x183   :  { %v961_v6 = vmax.f32 %v894_v23, %v940_v2  ;;  %2709 = vmatprep.subr.mxu1 %v1240_v13  ;;  %v1443_v2 = vld [vmem:[%s4149_s5 + $0xd0] sm:$0xff] }
 0x184   :  { %2504 = vmatprep.mubr.msk.f32.mxu1 %vm985_vm6, %v962_v40  ;;  %2710 = vmatpush3.msra.mxu1 %v1240_v13  ;;  %v1540_v40 = vld [vmem:[%s4149_s5 + $0x118] sm:$0xff] }
 0x185   :  { %1087 = vmatmul.mubr.f32.gmra.mxu1 %v961_v6  ;;  %v931_v11 = vpop.permute.xlu1 %930  ;;  %v933_v42 = vpop.permute.xlu0 %932  ;;  %2711 = vmatprep.subr.mxu1 %v1239_v14 }
 0x186   :  { %v941_v3 = vsel %vm936_vm5, %v929_v19, %v931_v11  ;;  %v964_v43 = vmax.f32 %v897_v22, %v931_v11  ;;  %2712 = vmatpush3.msra.mxu1 %v1239_v14 }
 0x187   :  { %v963_v44 = vmax.f32 %v896_v49, %v941_v3  ;;  %2713 = vmatprep.subr.mxu1 %v1238_v16 }
 0x188   :  { %2505 = vmatprep.mubr.msk.f32.mxu1 %vm985_vm6, %v964_v43  ;;  %2714 = vmatpush3.msra.mxu1 %v1238_v16 }
 0x189   :  { %1092 = vmatmul.mubr.f32.gmra.mxu1 %v963_v44  ;;  %v935_v0 = vpop.permute.xlu1 %934  ;;  %2715 = vmatprep.subr.mxu1 %v1237_v63 }
 0x18a   :  { %v942_v29 = vsel %vm936_vm5, %v933_v42, %v935_v0  ;;  %v966_v5 = vmax.f32 %v899_v35, %v935_v0  ;;  %2716 = vmatpush3.msra.mxu1 %v1237_v63  ;;  %v1626_v63 = vld [vmem:[%s4149_s5 + $0x130] sm:$0xff] }
 0x18b   :  { %v965_v8 = vmax.f32 %v898_v33, %v942_v29  ;;  %2717 = vmatprep.subr.mxu1 %v1236_v41 }
 0x18c   :  { %2506 = vmatprep.mubr.msk.f32.mxu1 %vm985_vm6, %v966_v5  ;;  %2718 = vmatpush3.msra.mxu1 %v1236_v41  ;;  %v1624_v41 = vld [vmem:[%s4149_s5 + $0x120] sm:$0xff] }
 0x18d   :  { %1097 = vmatmul.mubr.f32.gmra.mxu1 %v965_v8  ;;  %2719 = vmatprep.subr.mxu1 %v1235_v7 }
 0x18e   :  { %2720 = vmatpush3.msra.mxu1 %v1235_v7  ;;  %v1740_v7 = vld [vmem:[%s4151_s7 + $0x70] sm:$0xff] }
 0x18f   :  { %2721 = vmatprep.subr.mxu1 %v1234_v38 }
 0x190   :  { %2722 = vmatpush3.msra.mxu1 %v1234_v38  ;;  %v1738_v38 = vld [vmem:[%s4151_s7 + $0x60] sm:$0xff] }
 0x191   :  { %2723 = vmatprep.subr.mxu1 %v1233_v56 }
 0x192   :  { %2724 = vmatpush3.msra.mxu1 %v1233_v56  ;;  %v1736_v56 = vld [vmem:[%s4151_s7 + $0x50] sm:$0xff] }
 0x193   :  { %2749 = vmatprep.subr.mxu1 %v1443_v2 }
 0x239   :  { %v1073_v17 = vpop.f32.mrf.mxu1 }
 0x23a   :  { %v1108_v32 = vrot.slane %v1073_v17, 1 }
 0x23b   :  { %v1075_v18 = vpop.f32.mrf.mxu1 }
 0x23c   :  { %v1539_v18 = vld [vmem:[%s4149_s5 + $0x110] sm:$0xff] }
 0x23d   :  { %v1078_v46 = vpop.f32.mrf.mxu1 }
 0x23e   :  { %v1109_v52 = vrot.slane %v1078_v46, 1 }
 0x23f   :  { %v1080_v47 = vpop.f32.mrf.mxu1 }
 0x240   :  { %v1110_v33 = vsel %vm220_vm2, %v1108_v32, %v1109_v52  ;;  %v1441_v47 = vld [vmem:[%s4149_s5 + $0xc0] sm:$0xff]  ;;  %v1532_v32 = vld [vmem:[%s4149_s5 + $0xd8] sm:$0xff] }
 0x241   :  { %v1083_v1 = vpop.f32.mrf.mxu1  ;;  %v1125_v35 = vmax.f32 %v1073_v17, %v1110_v33  ;;  %v1442_v17 = vld [vmem:[%s4149_s5 + $0xc8] sm:$0xff]  ;;  %v1632_v33 = vld [vmem:[%s4149_s5 + $0x160] sm:$0xff] }
 0x242   :  { %v1111_v31 = vrot.slane %v1083_v1, 1 }
 0x243   :  { %v1085_v53 = vpop.f32.mrf.mxu1 }
 0x244   :  { %v1112_v59 = vsel %vm220_vm2, %v1109_v52, %v1111_v31 }
 0x245   :  { %v1088_v20 = vpop.f32.mrf.mxu1  ;;  %v1126_v55 = vmax.f32 %v1078_v46, %v1112_v59 }
 0x246   :  { %v1113_v27 = vrot.slane %v1088_v20, 1 }
 0x247   :  { %v1090_v21 = vpop.f32.mrf.mxu1 }
 0x248   :  { %v1114_v15 = vsel %vm220_vm2, %v1111_v31, %v1113_v27  ;;  %v1534_v31 = vld [vmem:[%s4149_s5 + $0xe8] sm:$0xff] }
 0x249   :  { %v1093_v48 = vpop.f32.mrf.mxu1  ;;  %v1127_v22 = vmax.f32 %v1083_v1, %v1114_v15  ;;  %v1538_v1 = vld [vmem:[%s4149_s5 + $0x108] sm:$0xff] }
 0x24a   :  { %v1115_v25 = vrot.slane %v1093_v48, 1 }
 0x24b   :  { %v1095_v23 = vpop.f32.mrf.mxu1 }
 0x24c   :  { %v1116_v45 = vsel %vm220_vm2, %v1113_v27, %v1115_v25  ;;  %v1440_v23 = vld [vmem:[%s4149_s5 + $0xb8] sm:$0xff] }
 0x24d   :  { %v1098_v9 = vpop.f32.mrf.mxu1  ;;  %v1128_v57 = vmax.f32 %v1088_v20, %v1116_v45  ;;  %v1536_v27 = vld [vmem:[%s4149_s5 + $0xf8] sm:$0xff] }
 0x24e   :  { %v1117_v26 = vrot.slane %v1098_v9, 1  ;;  %v1436_v45 = vld [vmem:[%s4149_s5 + $0x98] sm:$0xff] }
 0x24f   :  { %v1100_v28 = vpop.f32.mrf.mxu1 }
 0x250   :  { %v1118_v30 = vsel %vm220_vm2, %v1115_v25, %v1117_v26  ;;  %v1130_v51 = vmax.f32 %v1098_v9, %v1117_v26  ;;  %v1537_v25 = vld [vmem:[%s4149_s5 + $0x100] sm:$0xff]  ;;  %v1439_v26 = vld [vmem:[%s4149_s5 + $0xb0] sm:$0xff]  ;;  %v1438_v28 = vld [vmem:[%s4149_s5 + $0xa8] sm:$0xff] }
 0x251   :  { %v1129_v49 = vmax.f32 %v1093_v48, %v1118_v30  ;;  %v1535_v30 = vld [vmem:[%s4149_s5 + $0xf0] sm:$0xff] }
 0x252   :  { %2687 = vmatpush3.msk.msra.mxu0 %vm220_vm2, %v1130_v51  ;;  %v1437_v51 = vld [vmem:[%s4149_s5 + $0xa0] sm:$0xff] }
 0x253   :  { %2688 = vmatprep.subr.mxu0 %v3014_v10 }
 0x254   :  { %2689 = vmatpush3.msra.mxu0 %v1129_v49  ;;  %v1533_v49 = vld [vmem:[%s4149_s5 + $0xe0] sm:$0xff] }
 0x255   :  { %2690 = vmatprep.subr.mxu0 %v3014_v10 }
 0x256   :  { %2691 = vmatpush3.msra.mxu0 %v1128_v57  ;;  %v1435_v57 = vld [vmem:[%s4149_s5 + $0x90] sm:$0xff] }
 0x257   :  { %2692 = vmatprep.subr.mxu0 %v3014_v10 }
 0x258   :  { %2693 = vmatpush3.msra.mxu0 %v1127_v22 }
 0x259   :  { %2694 = vmatprep.subr.mxu0 %v3014_v10 }
 0x25a   :  { %2695 = vmatpush3.msra.mxu0 %v1126_v55 }
 0x25b   :  { %2696 = vmatprep.subr.mxu0 %v3014_v10 }
 0x25c   :  { %2697 = vmatpush3.msra.mxu0 %v1125_v35 }
 0x25d   :  { %2699 = vmatmul.mubr.msk.f32.vlgmr.msra.gmra.mxu0 %vm1134_vm8, %v1131_v58  ;;  %2728 = vmatprep.subr.mxu0 %v1346_v60 }
 0x25e   :  { %2701 = vmatprep.mubr.msk.f32.mxu0 %vm3016_vm7, %v3014_v10  ;;  %2729 = vmatpush3.msra.mxu0 %v1346_v60 }
 0x25f   :  { %2730 = vmatprep.subr.mxu0 %v1345_v61 }
 0x260   :  { %2731 = vmatpush3.msra.mxu0 %v1345_v61  ;;  %v1631_v61 = vld [vmem:[%s4149_s5 + $0x158] sm:$0xff] }
 0x261   :  { %2702 = vmatmul.mubr.msk.f32.gmra.mxu0 %vm1134_vm8, %v1132_v4  ;;  %2732 = vmatprep.subr.mxu0 %v1344_v36  ;;  %v1630_v4 = vld [vmem:[%s4149_s5 + $0x150] sm:$0xff] }
 0x262   :  { %2704 = vmatprep.mubr.msk.f32.mxu0 %vm3016_vm7, %v3014_v10  ;;  %2733 = vmatpush3.msra.mxu0 %v1344_v36  ;;  %v1629_v36 = vld [vmem:[%s4149_s5 + $0x148] sm:$0xff] }
 0x263   :  { %2734 = vmatprep.subr.mxu0 %v1343_v37 }
 0x264   :  { %2735 = vmatpush3.msra.mxu0 %v1343_v37  ;;  %v1628_v37 = vld [vmem:[%s4149_s5 + $0x140] sm:$0xff] }
 0x265   :  { %2705 = vmatmul.mubr.msk.f32.gmra.mxu0 %vm1134_vm8, %v1133_v62  ;;  %2736 = vmatprep.subr.mxu0 %v1342_v39  ;;  %v1627_v62 = vld [vmem:[%s4149_s5 + $0x138] sm:$0xff] }
 0x266   :  { %2737 = vmatpush3.msra.mxu0 %v1342_v39  ;;  %v1625_v39 = vld [vmem:[%s4149_s5 + $0x128] sm:$0xff] }
 0x267   :  { %2738 = vmatprep.subr.mxu0 %v1341_v24 }
 0x268   :  { %2739 = vmatpush3.msra.mxu0 %v1341_v24  ;;  %v1741_v24 = vld [vmem:[%s4151_s7 + $0x78] sm:$0x7f] }
 0x269   :  { %2740 = vmatprep.subr.mxu0 %v1340_v34 }
 0x26a   :  { %2741 = vmatpush3.msra.mxu0 %v1340_v34  ;;  %v1739_v34 = vld [vmem:[%s4151_s7 + $0x68] sm:$0xff] }
 0x26b   :  { %2742 = vmatprep.subr.mxu0 %v1339_v50 }
 0x26c   :  { %2743 = vmatpush3.msra.mxu0 %v1339_v50  ;;  %v1737_v50 = vld [vmem:[%s4151_s7 + $0x58] sm:$0xff] }
 0x26d   :  { %2744 = vmatprep.subr.mxu0 %v1338_v54 }
 0x26e   :  { %2745 = vmatpush3.msra.mxu0 %v1338_v54  ;;  %v1735_v54 = vld [vmem:[%s4151_s7 + $0x48] sm:$0xff] }
 0x26f   :  { %2770 = vmatprep.subr.mxu0 %v1540_v40 }
 0x31d   :  { %v3699_v6 = vpop.f32.mrf.mxu0 }
 0x31e   :  { %2725 = vmatprep.mubr.msk.f32.mxu1 %vm1242_vm9, %v3699_v6  ;;  %v1331_v3 = vrot.slane %v3699_v6, 1  ;;  %v1428_v20 = vrot.slane %v3699_v6, 2  ;;  %v1525_v21 = vrot.slane %v3699_v6, 3  ;;  %v1622_v55 = vrot.slane %v3699_v6, 4  ;;  %v1732_v6 = vld [vmem:[%s4151_s7 + $0x30] sm:$0xff] }
 0x31f   :  { %v2700_v19 = vpop.f32.mrf.mxu0 }
 0x320   :  { %v1731_v19 = vld [vmem:[%s4151_s7 + $0x28] sm:$0xff] }
 0x321   :  { %v3703_v11 = vpop.f32.mrf.mxu0 }
 0x322   :  { %v1332_v43 = vrot.slane %v3703_v11, 1  ;;  %v1230_v8 = vrot.slane %v3703_v11, 4  ;;  %v1335_v12 = vrot.slane %v3703_v11, 5  ;;  %v1429_v46 = vrot.slane %v3703_v11, 2 }
 0x323   :  { %v2703_v44 = vpop.f32.mrf.mxu0  ;;  %v1526_v53 = vrot.slane %v3703_v11, 3  ;;  %v1432_v59 = vrot.slane %v3703_v11, 6  ;;  %v1529_v22 = vrot.slane %v3703_v11, 7  ;;  %v1730_v11 = vld [vmem:[%s4151_s7 + $0x20] sm:$0xff] }
 0x324   :  { %v1333_v42 = vsel %vm220_vm2, %v1331_v3, %v1332_v43  ;;  %v1430_v48 = vsel %vm401_vm3, %v1428_v20, %v1429_v46  ;;  %v1623_v60 = vsel %vm88_vm0, %v1622_v55, %v1230_v8  ;;  %v1729_v3 = vld [vmem:[%s4151_s7 + $0x18] sm:$0xff]  ;;  %v1728_v43 = vld [vmem:[%s4151_s7 + $0x10] sm:$0xff] }
 0x325   :  { %v3708_v0 = vpop.f32.mrf.mxu0  ;;  %2746 = vmatprep.mubr.msk.f32.mxu0 %vm1242_vm9, %v1333_v42  ;;  %v1527_v9 = vsel %vm555_vm4, %v1525_v21, %v1526_v53  ;;  %v2513_v42 = vld [vmem:[%s4150_s6] ss:$0 sm:$0xff]  ;;  %s2448_s6 = sshll.u32 %s3017_s21, 4  ;;  %s2449_s6 = int_to_ptr.vmem [resolvable:$true] %s2448_s6 }
 0x326   :  { %v1231_v29 = vrot.slane %v3708_v0, 4  ;;  %v1336_v5 = vrot.slane %v3708_v0, 5  ;;  %v1433_v52 = vrot.slane %v3708_v0, 6  ;;  %v1530_v15 = vrot.slane %v3708_v0, 7  ;;  %p2997_p1 = scmp.lt.s32.totalorder %s2449_s6, %s2449_s6 }
 0x327   :  { %v2706_v13 = vpop.f32.mrf.mxu0 }
 0x328   :  { %v1232_v14 = vsel %vm88_vm0, %v1230_v8, %v1231_v29  ;;  %v1337_v16 = vsel %vm1334_vm10, %v1335_v12, %v1336_v5  ;;  %v1434_v35 = vsel %vm1431_vm11, %v1432_v59, %v1433_v52  ;;  %v1531_v58 = vsel %vm1528_vm12, %v1529_v22, %v1530_v15  ;;  %v1727_v13 = vld [vmem:[%s4151_s7 + $0x8] sm:$0xff]  ;;  %v2008_v52 = vld [vmem:[%s4153_s9 + $0x70] sm:$0xff] }
 0x329   :  { %2726 = vmatmul.mubr.msk.f32.vlgmr.msra.gmra.mxu1 %vm1242_vm9, %v1232_v14  ;;  %2747 = vmatmul.mubr.msk.f32.vlgmr.msra.gmra.mxu0 %vm1242_vm9, %v1337_v16  ;;  %v2007_v15 = vld [vmem:[%s4153_s9 + $0x68] sm:$0xff]  ;;  %v2004_v59 = vld [vmem:[%s4153_s9 + $0x50] sm:$0xff] }
 0x32a   :  { %2750 = vmatpush3.msra.mxu1 %v1443_v2  ;;  %2771 = vmatpush3.msra.mxu0 %v1540_v40  ;;  %v1734_v2 = vld [vmem:[%s4151_s7 + $0x40] sm:$0xff]  ;;  %v1733_v40 = vld [vmem:[%s4151_s7 + $0x38] sm:$0xff]  ;;  %v2003_v22 = vld [vmem:[%s4153_s9 + $0x48] sm:$0xff] }
 0x32b   :  { %2751 = vmatprep.subr.mxu1 %v1442_v17  ;;  %2772 = vmatprep.subr.mxu0 %v1539_v18 }
 0x32c   :  { %2752 = vmatpush3.msra.mxu1 %v1442_v17  ;;  %2773 = vmatpush3.msra.mxu0 %v1539_v18  ;;  %v1726_v18 = vld [vmem:[%s4151_s7] sm:$0xff] }
 0x32d   :  { %2753 = vmatprep.subr.mxu1 %v1441_v47  ;;  %2774 = vmatprep.subr.mxu0 %v1538_v1 }
 0x32e   :  { %2754 = vmatpush3.msra.mxu1 %v1441_v47  ;;  %2767 = vmatprep.mubr.msk.f32.mxu1 %vm1242_vm9, %v1430_v48 }
 0x32f   :  { %2775 = vmatpush3.msra.mxu0 %v1538_v1  ;;  %2788 = vmatprep.mubr.msk.f32.mxu0 %vm1242_vm9, %v1527_v9 }
 0x330   :  { %2755 = vmatprep.subr.mxu1 %v1440_v23  ;;  %2776 = vmatprep.subr.mxu0 %v1537_v25 }
 0x331   :  { %2756 = vmatpush3.msra.mxu1 %v1440_v23  ;;  %2777 = vmatpush3.msra.mxu0 %v1537_v25 }
 0x332   :  { %2757 = vmatprep.subr.mxu1 %v1439_v26  ;;  %2778 = vmatprep.subr.mxu0 %v1536_v27 }
 0x333   :  { %2758 = vmatpush3.msra.mxu1 %v1439_v26  ;;  %2779 = vmatpush3.msra.mxu0 %v1536_v27 }
 0x334   :  { %2759 = vmatprep.subr.mxu1 %v1438_v28  ;;  %2780 = vmatprep.subr.mxu0 %v1535_v30 }
 0x335   :  { %2760 = vmatpush3.msra.mxu1 %v1438_v28  ;;  %2781 = vmatpush3.msra.mxu0 %v1535_v30 }
 0x336   :  { %2761 = vmatprep.subr.mxu1 %v1437_v51  ;;  %2782 = vmatprep.subr.mxu0 %v1534_v31 }
 0x337   :  { %2762 = vmatpush3.msra.mxu1 %v1437_v51  ;;  %2783 = vmatpush3.msra.mxu0 %v1534_v31 }
 0x338   :  { %2763 = vmatprep.subr.mxu1 %v1436_v45  ;;  %2784 = vmatprep.subr.mxu0 %v1533_v49 }
 0x339   :  { %2764 = vmatpush3.msra.mxu1 %v1436_v45  ;;  %2785 = vmatpush3.msra.mxu0 %v1533_v49  ;;  %v2009_v49 = vld [vmem:[%s4153_s9 + $0x78] sm:$0xff] }
 0x33a   :  { %2765 = vmatprep.subr.mxu1 %v1435_v57  ;;  %2786 = vmatprep.subr.mxu0 %v1532_v32 }
 0x33b   :  { %2766 = vmatpush3.msra.mxu1 %v1435_v57  ;;  %2787 = vmatpush3.msra.mxu0 %v1532_v32  ;;  %v2006_v57 = vld [vmem:[%s4153_s9 + $0x60] sm:$0xff]  ;;  %v2005_v32 = vld [vmem:[%s4153_s9 + $0x58] sm:$0xff] }
 0x33c   :  { %2768 = vmatmul.mubr.msk.f32.vlgmr.msra.gmra.mxu1 %vm1242_vm9, %v1434_v35  ;;  %2789 = vmatmul.mubr.msk.f32.vlgmr.msra.gmra.mxu0 %vm1242_vm9, %v1531_v58 }
 0x33d   :  { %2791 = vmatprep.subr.mxu1 %v1632_v33  ;;  %2809 = vmatprep.mubr.msk.f32.mxu1 %vm1242_vm9, %v1623_v60 }
 0x33e   :  { %2792 = vmatpush3.msra.mxu1 %v1632_v33  ;;  %2812 = vmatprep.subr.msk.mxu0 %vm220_vm2, %v1741_v24 }
 0x33f   :  { %2793 = vmatprep.subr.mxu1 %v1631_v61  ;;  %2813 = vmatpush3.msk.msra.mxu0 %vm220_vm2, %v1741_v24  ;;  %v1915_v24 = vld [vmem:[%s4153_s9 + $0x10] sm:$0xff] }
 0x340   :  { %2794 = vmatpush3.msra.mxu1 %v1631_v61  ;;  %2814 = vmatprep.subr.mxu0 %v1740_v7 }
 0x341   :  { %2795 = vmatprep.subr.mxu1 %v1630_v4  ;;  %2815 = vmatpush3.msra.mxu0 %v1740_v7  ;;  %v1914_v7 = vld [vmem:[%s4153_s9 + $0x8] sm:$0xff] }
 0x342   :  { %2796 = vmatpush3.msra.mxu1 %v1630_v4  ;;  %2816 = vmatprep.subr.mxu0 %v1739_v34 }
 0x343   :  { %2797 = vmatprep.subr.mxu1 %v1629_v36  ;;  %2817 = vmatpush3.msra.mxu0 %v1739_v34  ;;  %v1913_v34 = vld [vmem:[%s4153_s9] sm:$0xff] }
 0x344   :  { %2798 = vmatpush3.msra.mxu1 %v1629_v36  ;;  %2818 = vmatprep.subr.mxu0 %v1738_v38  ;;  %v1835_v36 = vld [vmem:[%s4152_s8] sm:$0xff] }
 0x345   :  { %2799 = vmatprep.subr.mxu1 %v1628_v37  ;;  %2819 = vmatpush3.msra.mxu0 %v1738_v38  ;;  %v2002_v38 = vld [vmem:[%s4153_s9 + $0x40] sm:$0xff] }
 0x346   :  { %2800 = vmatpush3.msra.mxu1 %v1628_v37  ;;  %2820 = vmatprep.subr.mxu0 %v1737_v50  ;;  %v1920_v37 = vld [vmem:[%s4153_s9 + $0x38] sm:$0xff] }
 0x347   :  { %2801 = vmatprep.subr.mxu1 %v1627_v62  ;;  %2821 = vmatpush3.msra.mxu0 %v1737_v50  ;;  %v2091_v50 = vld [vmem:[%s4153_s9 + $0xb8] sm:$0xff] }
 0x348   :  { %2802 = vmatpush3.msra.mxu1 %v1627_v62  ;;  %2822 = vmatprep.subr.mxu0 %v1736_v56  ;;  %v1919_v62 = vld [vmem:[%s4153_s9 + $0x30] sm:$0xff] }
 0x349   :  { %2803 = vmatprep.subr.mxu1 %v1626_v63  ;;  %2823 = vmatpush3.msra.mxu0 %v1736_v56 }
 0x34a   :  { %2804 = vmatpush3.msra.mxu1 %v1626_v63  ;;  %2824 = vmatprep.subr.mxu0 %v1735_v54  ;;  %v1918_v63 = vld [vmem:[%s4153_s9 + $0x28] sm:$0xff] }
 0x34b   :  { %2805 = vmatprep.subr.mxu1 %v1625_v39  ;;  %2825 = vmatpush3.msra.mxu0 %v1735_v54 }
 0x34c   :  { %2806 = vmatpush3.msra.mxu1 %v1625_v39  ;;  %2826 = vmatprep.subr.mxu0 %v1734_v2  ;;  %v1917_v39 = vld [vmem:[%s4153_s9 + $0x20] sm:$0xff] }
 0x34d   :  { %2807 = vmatprep.subr.mxu1 %v1624_v41  ;;  %2827 = vmatpush3.msra.mxu0 %v1734_v2  ;;  %v2090_v2 = vld [vmem:[%s4153_s9 + $0xb0] sm:$0xff] }
 0x34e   :  { %2808 = vmatpush3.msra.mxu1 %v1624_v41  ;;  %2828 = vmatprep.subr.mxu0 %v1733_v40  ;;  %v1916_v41 = vld [vmem:[%s4153_s9 + $0x18] sm:$0xff] }
 0x34f   :  { %2810 = vmatmul.mubr.msk.f32.vlgmr.msra.gmra.mxu1 %vm1242_vm9, %v3708_v0  ;;  %2847 = vmatprep.subr.mxu1 %v3014_v10 }
 0x350   :  { %2851 = vmatprep.mubr.msk.f32.mxu1 %vm3016_vm7, %v3014_v10  ;;  %2829 = vmatpush3.msra.mxu0 %v1733_v40  ;;  %v2173_v40 = vld [vmem:[%s4153_s9 + $0xf8] sm:$0xff] }
 0x351   :  { %2830 = vmatprep.subr.mxu0 %v1732_v6 }
 0x352   :  { %2831 = vmatpush3.msra.mxu0 %v1732_v6 }
 0x353   :  { %2832 = vmatprep.subr.mxu0 %v1731_v19 }
 0x354   :  { %2833 = vmatpush3.msra.mxu0 %v1731_v19  ;;  %v2089_v19 = vld [vmem:[%s4153_s9 + $0xa8] sm:$0xff] }
 0x355   :  { %2834 = vmatprep.subr.mxu0 %v1730_v11 }
 0x356   :  { %2835 = vmatpush3.msra.mxu0 %v1730_v11  ;;  %v2172_v11 = vld [vmem:[%s4153_s9 + $0xf0] sm:$0xff] }
 0x357   :  { %2836 = vmatprep.subr.mxu0 %v1729_v3 }
 0x358   :  { %2837 = vmatpush3.msra.mxu0 %v1729_v3  ;;  %v2088_v3 = vld [vmem:[%s4153_s9 + $0xa0] sm:$0xff] }
 0x359   :  { %2838 = vmatprep.subr.mxu0 %v1728_v43 }
 0x35a   :  { %2839 = vmatpush3.msra.mxu0 %v1728_v43  ;;  %v2171_v43 = vld [vmem:[%s4153_s9 + $0xe8] sm:$0xff] }
 0x35b   :  { %2840 = vmatprep.subr.mxu0 %v1727_v13 }
 0x35c   :  { %2841 = vmatpush3.msra.mxu0 %v1727_v13  ;;  %v2167_v13 = vld [vmem:[%s4153_s9 + $0xc8] sm:$0xff] }
 0x35d   :  { %2842 = vmatprep.subr.mxu0 %v1726_v18 }
 0x35e   :  { %2843 = vmatpush3.msra.mxu0 %v1726_v18  ;;  %v2263_v18 = vld [vmem:[%s4155_s11 + $0x70] sm:$0xff] }
 0x35f   :  { %2873 = vmatprep.subr.mxu0 %v3014_v10 }
 0x3e9   :  { %v2727_v44 = vpop.f32.mrf.mxu1  ;;  %v2748_v5 = vpop.f32.mrf.mxu0 }
 0x3ea   :  { %v1330_v29 = vadd.f32 %v2727_v44, %v2513_v42  ;;  %v2087_v44 = vld [vmem:[%s4153_s9 + $0x98] sm:$0xff] }
 0x3eb   :  { %v1314_v0 = vpop.f32.mrf.mxu1  ;;  %v1417_v16 = vpop.f32.mrf.mxu0 }
 0x3ec   :  { %v1329_v12 = vadd.f32 %v2513_v42, %v1314_v0  ;;  %v1427_v14 = vadd.f32 %v2748_v5, %v1330_v29  ;;  %v2170_v42 = vld [vmem:[%s4153_s9 + $0xe0] sm:$0xff]  ;;  %v2086_v0 = vld [vmem:[%s4153_s9 + $0x90] sm:$0xff]  ;;  %v2169_v29 = vld [vmem:[%s4153_s9 + $0xd8] sm:$0xff] }
 0x3ed   :  { %v2085_v5 = vld [vmem:[%s4153_s9 + $0x88] sm:$0xff] }
 0x3ee   :  { %v1426_v46 = vadd.f32 %v1417_v16, %v1329_v12  ;;  %v2084_v12 = vld [vmem:[%s4153_s9 + $0x80] sm:$0xff] }
 0x3ef   :  { %v2166_v16 = vld [vmem:[%s4153_s9 + $0xc0] sm:$0xff] }
 0x3fc   :  { %v2769_v8 = vpop.f32.mrf.mxu1  ;;  %v2790_v1 = vpop.f32.mrf.mxu0 }
 0x3fd   :  { %v1524_v47 = vadd.f32 %v2769_v8, %v1427_v14  ;;  %v2168_v8 = vld [vmem:[%s4153_s9 + $0xd0] sm:$0xff] }
 0x3fe   :  { %v1514_v17 = vpop.f32.mrf.mxu1  ;;  %v1611_v21 = vpop.f32.mrf.mxu0 }
 0x3ff   :  { %v1523_v53 = vadd.f32 %v1514_v17, %v1426_v46  ;;  %v1621_v20 = vadd.f32 %v2790_v1, %v1524_v47  ;;  %v2262_v46 = vld [vmem:[%s4155_s11 + $0x68] sm:$0xff]  ;;  %v2261_v47 = vld [vmem:[%s4155_s11 + $0x60] sm:$0xff]  ;;  %v2260_v1 = vld [vmem:[%s4155_s11 + $0x58] sm:$0xff] }
 0x401   :  { %v1620_v23 = vadd.f32 %v1611_v21, %v1523_v53  ;;  %v2259_v53 = vld [vmem:[%s4155_s11 + $0x50] sm:$0xff]  ;;  %v2257_v21 = vld [vmem:[%s4155_s11 + $0x40] sm:$0xff] }
 0x40f   :  { %v2811_v48 = vpop.f32.mrf.mxu1 }
 0x410   :  { %v1713_v25 = vadd.f32 %v2811_v48, %v1621_v20  ;;  %v2258_v20 = vld [vmem:[%s4155_s11 + $0x48] sm:$0xff]  ;;  %v2256_v48 = vld [vmem:[%s4155_s11 + $0x38] sm:$0xff] }
 0x411   :  { %v1703_v9 = vpop.f32.mrf.mxu1 }
 0x412   :  { %v1715_v26 = vmax.f32 %v1713_v25, 0.0  ;;  %v1712_v27 = vadd.f32 %v1703_v9, %v1620_v23  ;;  %v2255_v23 = vld [vmem:[%s4155_s11 + $0x30] sm:$0xff]  ;;  %v2254_v25 = vld [vmem:[%s4155_s11 + $0x28] sm:$0xff]  ;;  %v2253_v9 = vld [vmem:[%s4155_s11 + $0x20] sm:$0xff] }
 0x414   :  { %v1714_v28 = vmax.f32 %v1712_v27, 0.0  ;;  %1720 = vrot.lane.b32.xlu1 %v1715_v26, %s3015_s3  ;;  %v2251_v27 = vld [vmem:[%s4155_s11 + $0x10] sm:$0xff] }
 0x416   :  { %1718 = vrot.lane.b32.xlu0 %v1714_v28, %s3015_s3 }
 0x486   :  { %v1721_v30 = vpop.permute.xlu1 %1720 }
 0x487   :  { %v1725_v45 = vmax.f32 %v1715_v26, %v1721_v30  ;;  %v2252_v26 = vld [vmem:[%s4155_s11 + $0x18] sm:$0xff]  ;;  %v2249_v30 = vld [vmem:[%s4155_s11] sm:$0xff] }
 0x488   :  { %v1719_v51 = vpop.permute.xlu0 %1718 }
 0x489   :  { %v1724_v31 = vmax.f32 %v1714_v28, %v1719_v51  ;;  %v2250_v28 = vld [vmem:[%s4155_s11 + $0x8] sm:$0xff]  ;;  %v2356_v51 = vld [vmem:[%s4157_s13 + $0x50] sm:$0xf] }
 0x48b   :  { %2844 = vmatprep.mubr.msk.f32.mxu0 %vm936_vm5, %v1724_v31  ;;  %v2355_v31 = vld [vmem:[%s4157_s13 + $0x48] sm:$0xff] }
 0x48c   :  { %2845 = vmatmul.mubr.msk.f32.vlgmr.msra.gmra.mxu0 %vm936_vm5, %v1725_v45  ;;  %v2354_v45 = vld [vmem:[%s4157_s13 + $0x40] sm:$0xff] }
 0x48d   :  { %2889 = vmatprep.mubr.msk.f32.mxu0 %vm3016_vm7, %v3014_v10  ;;  %2874 = vmatpush3.msra.mxu0 %v2009_v49  ;;  %v2353_v49 = vld [vmem:[%s4157_s13 + $0x38] sm:$0xff] }
 0x48e   :  { %2875 = vmatprep.subr.mxu0 %v3014_v10 }
 0x48f   :  { %2876 = vmatpush3.msra.mxu0 %v2008_v52  ;;  %v2352_v52 = vld [vmem:[%s4157_s13 + $0x30] sm:$0xff] }
 0x490   :  { %2877 = vmatprep.subr.mxu0 %v3014_v10 }
 0x491   :  { %2878 = vmatpush3.msra.mxu0 %v2007_v15  ;;  %v2351_v15 = vld [vmem:[%s4157_s13 + $0x28] sm:$0xff] }
 0x492   :  { %2879 = vmatprep.subr.mxu0 %v3014_v10 }
 0x493   :  { %2880 = vmatpush3.msra.mxu0 %v2006_v57  ;;  %v2350_v57 = vld [vmem:[%s4157_s13 + $0x20] sm:$0xff] }
 0x494   :  { %2881 = vmatprep.subr.mxu0 %v3014_v10 }
 0x495   :  { %2882 = vmatpush3.msra.mxu0 %v2005_v32  ;;  %v2349_v32 = vld [vmem:[%s4157_s13 + $0x18] sm:$0xff] }
 0x496   :  { %2883 = vmatprep.subr.mxu0 %v3014_v10 }
 0x497   :  { %2884 = vmatpush3.msra.mxu0 %v2004_v59 }
 0x498   :  { %2885 = vmatprep.subr.mxu0 %v3014_v10 }
 0x499   :  { %2886 = vmatpush3.msra.mxu0 %v2003_v22 }
 0x49a   :  { %2887 = vmatprep.subr.mxu0 %v3014_v10 }
 0x49b   :  { %2888 = vmatpush3.msra.mxu0 %v2002_v38 }
 0x49c   :  { %2911 = vmatprep.subr.mxu0 %v3014_v10 }
 0x54c   :  { %v2846_v33 = vpop.f32.mrf.mxu0 }
 0x54d   :  { %v1829_v55 = vrot.slane %v2846_v33, 1 }
 0x54e   :  { %v1817_v35 = vpop.f32.mrf.mxu0 }
 0x54f   :  { %v1834_v58 = vmax.f32 %v2846_v33, %v1829_v55  ;;  %v1828_v60 = vrot.slane %v1817_v35, 1 }
 0x551   :  { %v1830_v61 = vsel %vm220_vm2, %v1828_v60, %v1829_v55  ;;  %2848 = vmatpush3.msk.msra.mxu1 %vm220_vm2, %v1834_v58 }
 0x552   :  { %v1833_v4 = vmax.f32 %v1817_v35, %v1830_v61  ;;  %2849 = vmatprep.subr.mxu1 %v3014_v10  ;;  %v2528_v35 = vld [vmem:[%s4154_s10] ss:$0 sm:$0xff] }
 0x554   :  { %2850 = vmatpush3.msra.mxu1 %v1833_v4 }
 0x555   :  { %2852 = vmatmul.mubr.msk.f32.vlgmr.msra.gmra.mxu1 %vm985_vm6, %v1835_v36  ;;  %2854 = vmatprep.subr.mxu1 %v3014_v10 }
 0x556   :  { %2855 = vmatpush3.msra.mxu1 %v1920_v37  ;;  %2870 = vmatprep.mubr.msk.f32.mxu1 %vm3016_vm7, %v3014_v10 }
 0x557   :  { %2856 = vmatprep.subr.mxu1 %v3014_v10 }
 0x558   :  { %2857 = vmatpush3.msra.mxu1 %v1919_v62 }
 0x559   :  { %2858 = vmatprep.subr.mxu1 %v3014_v10 }
 0x55a   :  { %2859 = vmatpush3.msra.mxu1 %v1918_v63 }
 0x55b   :  { %2860 = vmatprep.subr.mxu1 %v3014_v10 }
 0x55c   :  { %2861 = vmatpush3.msra.mxu1 %v1917_v39 }
 0x55d   :  { %2862 = vmatprep.subr.mxu1 %v3014_v10 }
 0x55e   :  { %2863 = vmatpush3.msra.mxu1 %v1916_v41  ;;  %v2348_v41 = vld [vmem:[%s4157_s13 + $0x10] sm:$0xff] }
 0x55f   :  { %2864 = vmatprep.subr.mxu1 %v3014_v10 }
 0x560   :  { %2865 = vmatpush3.msra.mxu1 %v1915_v24  ;;  %v2347_v24 = vld [vmem:[%s4157_s13 + $0x8] sm:$0xff] }
 0x561   :  { %2866 = vmatprep.subr.mxu1 %v3014_v10 }
 0x562   :  { %2867 = vmatpush3.msra.mxu1 %v1914_v7  ;;  %v2346_v7 = vld [vmem:[%s4157_s13] sm:$0xff]  ;;  %s2992_s13 = scalar_lea.vmem %s2449_s6, 32 }
 0x563   :  { %2868 = vmatprep.subr.mxu1 %v3014_v10  ;;  %p2993_p0 = scmp.ne.s32.totalorder %s2449_s6, %s2992_s13  ;;  %p2998_p2 = scmp.lt.s32.totalorder %s2992_s13, %s2992_s13 }
 0x564   :  { %2869 = vmatpush3.msra.mxu1 %v1913_v34  ;;  %v2532_v34 = vld [vmem:[%s4156_s12] ss:$0 sm:$0xff] }
 0x565   :  { %2892 = vmatprep.subr.mxu1 %v3014_v10  ;;  %p2999_p3 = por %p2998_p2, %p2997_p1 }
 0x567   :  { %p3000_p4 = pnand %p2999_p3, %p2993_p0 }
 0x615   :  { %v1908_v56 = vpop.f32.mrf.mxu1 }
 0x616   :  { %v2010_v54 = vrot.slane %v1908_v56, 2  ;;  %2871 = vmatmul.mubr.msk.f32.vlgmr.msra.gmra.mxu1 %vm1921_vm13, %v1908_v56  ;;  %v2092_v14 = vrot.slane %v1908_v56, 4  ;;  %v2174_v17 = vrot.slane %v1908_v56, 6 }
 0x617   :  { %2893 = vmatpush3.msra.mxu1 %v2091_v50  ;;  %v2853_v6 = vpop.f32.mrf.mxu1  ;;  %2908 = vmatprep.mubr.msk.f32.mxu1 %vm3016_vm7, %v3014_v10 }
 0x618   :  { %2894 = vmatprep.subr.mxu1 %v3014_v10  ;;  %2890 = vmatmul.mubr.msk.f32.vlgmr.msra.gmra.mxu0 %vm1921_vm13, %v2010_v54 }
 0x619   :  { %2895 = vmatpush3.msra.mxu1 %v2090_v2  ;;  %2912 = vmatpush3.msra.mxu0 %v2173_v40  ;;  %v2534_v2 = vld [vmem:[%s4158_s14] ss:$0 sm:$0xff] }
 0x61a   :  { %2896 = vmatprep.subr.mxu1 %v3014_v10  ;;  %2913 = vmatprep.subr.mxu0 %v3014_v10 }
 0x61b   :  { %2897 = vmatpush3.msra.mxu1 %v2089_v19  ;;  %2914 = vmatpush3.msra.mxu0 %v2172_v11 }
 0x61c   :  { %2898 = vmatprep.subr.mxu1 %v3014_v10  ;;  %2915 = vmatprep.subr.mxu0 %v3014_v10 }
 0x61d   :  { %2899 = vmatpush3.msra.mxu1 %v2088_v3  ;;  %2916 = vmatpush3.msra.mxu0 %v2171_v43 }
 0x61e   :  { %2900 = vmatprep.subr.mxu1 %v3014_v10  ;;  %2917 = vmatprep.subr.mxu0 %v3014_v10 }
 0x61f   :  { %2901 = vmatpush3.msra.mxu1 %v2087_v44  ;;  %2918 = vmatpush3.msra.mxu0 %v2170_v42 }
 0x620   :  { %2902 = vmatprep.subr.mxu1 %v3014_v10  ;;  %2919 = vmatprep.subr.mxu0 %v3014_v10 }
 0x621   :  { %2903 = vmatpush3.msra.mxu1 %v2086_v0  ;;  %2920 = vmatpush3.msra.mxu0 %v2169_v29 }
 0x622   :  { %2904 = vmatprep.subr.mxu1 %v3014_v10  ;;  %2921 = vmatprep.subr.mxu0 %v3014_v10 }
 0x623   :  { %2905 = vmatpush3.msra.mxu1 %v2085_v5  ;;  %2922 = vmatpush3.msra.mxu0 %v2168_v8 }
 0x624   :  { %2906 = vmatprep.subr.mxu1 %v3014_v10  ;;  %2923 = vmatprep.subr.mxu0 %v3014_v10 }
 0x625   :  { %2907 = vmatpush3.msra.mxu1 %v2084_v12  ;;  %2924 = vmatpush3.msra.mxu0 %v2167_v13 }
 0x626   :  { %2909 = vmatmul.mubr.msk.f32.vlgmr.msra.gmra.mxu1 %vm1921_vm13, %v2092_v14  ;;  %2925 = vmatprep.subr.mxu0 %v3014_v10 }
 0x627   :  { %2926 = vmatpush3.msra.mxu0 %v2166_v16  ;;  %2927 = vmatprep.mubr.msk.f32.mxu0 %vm3016_vm7, %v3014_v10 }
 0x628   :  { %2928 = vmatmul.mubr.msk.f32.vlgmr.msra.gmra.mxu0 %vm1921_vm13, %v2174_v17  ;;  %2930 = vmatprep.subr.mxu1 %v3014_v10 }
 0x629   :  { %2931 = vmatpush3.msra.mxu1 %v2263_v18  ;;  %2960 = vmatprep.mubr.msk.f32.mxu1 %vm3016_vm7, %v3014_v10 }
 0x62a   :  { %2932 = vmatprep.subr.mxu1 %v3014_v10  ;;  %2963 = vmatprep.subr.mxu0 %v3014_v10 }
 0x62b   :  { %2933 = vmatpush3.msra.mxu1 %v2262_v46  ;;  %2985 = vmatprep.mubr.msk.f32.mxu0 %vm3016_vm7, %v3014_v10 }
 0x62c   :  { %2934 = vmatprep.subr.mxu1 %v3014_v10  ;;  %2964 = vmatpush3.msk.msra.mxu0 %vm88_vm0, %v2356_v51 }
 0x62d   :  { %2935 = vmatpush3.msra.mxu1 %v2261_v47  ;;  %2965 = vmatprep.subr.mxu0 %v3014_v10 }
 0x62e   :  { %2936 = vmatprep.subr.mxu1 %v3014_v10  ;;  %2966 = vmatpush3.msra.mxu0 %v2355_v31 }
 0x62f   :  { %2937 = vmatpush3.msra.mxu1 %v2260_v1  ;;  %2967 = vmatprep.subr.mxu0 %v3014_v10 }
 0x630   :  { %2938 = vmatprep.subr.mxu1 %v3014_v10  ;;  %2968 = vmatpush3.msra.mxu0 %v2354_v45 }
 0x631   :  { %2939 = vmatpush3.msra.mxu1 %v2259_v53  ;;  %2969 = vmatprep.subr.mxu0 %v3014_v10 }
 0x632   :  { %2940 = vmatprep.subr.mxu1 %v3014_v10  ;;  %2970 = vmatpush3.msra.mxu0 %v2353_v49 }
 0x633   :  { %2941 = vmatpush3.msra.mxu1 %v2258_v20  ;;  %2971 = vmatprep.subr.mxu0 %v3014_v10 }
 0x634   :  { %2942 = vmatprep.subr.mxu1 %v3014_v10  ;;  %2972 = vmatpush3.msra.mxu0 %v2352_v52 }
 0x635   :  { %2943 = vmatpush3.msra.mxu1 %v2257_v21  ;;  %2973 = vmatprep.subr.mxu0 %v3014_v10 }
 0x636   :  { %2944 = vmatprep.subr.mxu1 %v3014_v10  ;;  %2974 = vmatpush3.msra.mxu0 %v2351_v15 }
 0x637   :  { %2945 = vmatpush3.msra.mxu1 %v2256_v48  ;;  %2975 = vmatprep.subr.mxu0 %v3014_v10 }
 0x638   :  { %2946 = vmatprep.subr.mxu1 %v3014_v10  ;;  %2976 = vmatpush3.msra.mxu0 %v2350_v57 }
 0x639   :  { %2947 = vmatpush3.msra.mxu1 %v2255_v23  ;;  %2977 = vmatprep.subr.mxu0 %v3014_v10 }
 0x63a   :  { %2948 = vmatprep.subr.mxu1 %v3014_v10  ;;  %2978 = vmatpush3.msra.mxu0 %v2349_v32 }
 0x63b   :  { %2949 = vmatpush3.msra.mxu1 %v2254_v25  ;;  %2979 = vmatprep.subr.mxu0 %v3014_v10 }
 0x63c   :  { %2950 = vmatprep.subr.mxu1 %v3014_v10  ;;  %2980 = vmatpush3.msra.mxu0 %v2348_v41 }
 0x63d   :  { %2951 = vmatpush3.msra.mxu1 %v2253_v9  ;;  %2981 = vmatprep.subr.mxu0 %v3014_v10 }
 0x63e   :  { %2952 = vmatprep.subr.mxu1 %v3014_v10  ;;  %2982 = vmatpush3.msra.mxu0 %v2347_v24 }
 0x63f   :  { %2953 = vmatpush3.msra.mxu1 %v2252_v26  ;;  %2983 = vmatprep.subr.mxu0 %v3014_v10 }
 0x640   :  { %2954 = vmatprep.subr.mxu1 %v3014_v10  ;;  %2984 = vmatpush3.msra.mxu0 %v2346_v7 }
 0x641   :  { %2955 = vmatpush3.msra.mxu1 %v2251_v27 }
 0x642   :  { %2956 = vmatprep.subr.mxu1 %v3014_v10 }
 0x643   :  { %2957 = vmatpush3.msra.mxu1 %v2250_v28 }
 0x644   :  { %2958 = vmatprep.subr.mxu1 %v3014_v10 }
 0x645   :  { %2959 = vmatpush3.msra.mxu1 %v2249_v30 }
 0x6d6   :  { %v1991_v59 = vpop.f32.mrf.mxu1 }
 0x6d7   :  { %v2001_v58 = vadd.f32 %v2528_v35, %v1991_v59 }
 0x6d8   :  { %v2872_v22 = vpop.f32.mrf.mxu1  ;;  %v2079_v33 = vpop.f32.mrf.mxu0 }
 0x6d9   :  { %v2083_v60 = vadd.f32 %v2079_v33, %v2001_v58 }
 0x6da   :  { %v2891_v55 = vpop.f32.mrf.mxu0 }
 0x6e6   :  { %v2161_v61 = vpop.f32.mrf.mxu1 }
 0x6e7   :  { %v2165_v4 = vadd.f32 %v2161_v61, %v2083_v60 }
 0x6e8   :  { %v2910_v36 = vpop.f32.mrf.mxu1  ;;  %v2243_v37 = vpop.f32.mrf.mxu0 }
 0x6e9   :  { %v2247_v62 = vadd.f32 %v2243_v37, %v2165_v4 }
 0x6ea   :  { %v2929_v63 = vpop.f32.mrf.mxu0 }
 0x6eb   :  { %v2248_v39 = vmax.f32 %v2247_v62, 0.0 }
 0x6ed   :  { %2961 = vmatmul.mubr.msk.f32.vlgmr.msra.gmra.mxu1 %vm2271_vm14, %v2248_v39 }
 0x7ad   :  { %v2341_v38 = vpop.f32.mrf.mxu1 }
 0x7ae   :  { %v2342_v50 = vadd.f32 %v2532_v34, %v2341_v38 }
 0x7af   :  { %v2962_v56 = vpop.f32.mrf.mxu1 }
 0x7b0   :  { %v2345_v54 = vmax.f32 %v2342_v50, 0.0 }
 0x7b2   :  { %2986 = vmatmul.mubr.msk.f32.vlgmr.msra.gmra.mxu0 %vm2364_vm15, %v2345_v54 }
 0x872   :  { %v2437_v40 = vpop.f32.mrf.mxu0 }
 0x873   :  { %v2438_v6 = vadd.f32 %v2534_v2, %v2437_v40 }
 0x874   :  { %v2987_v10 = vpop.f32.mrf.mxu0 }
 0x875   :  { %2441 = vst [vmem:[#allocation2] sm:$0x3] %v2438_v6 }
 0x876   :  { %3003 = shalt.err (!%p3000_p4)
}
 0x877   :  { %2451 = dma.vmem_to_hbm [thread:$0]  %s2449_s6, 32, %s4159_s15, [#allocation3]  }
 0x878   :  { %3012 = dma.done.wait [#allocation3], 32  }
 0x879   :  { %3013 = vsyncadd [#allocation3], 4294967264 }
 0x87a   :  { %2455 = vsyncpa [#allocation3], 1 }

</bundles_post_ra>
